<compile_context>
chip_gen: v6e
topology: v6e:2x2x1
jax: 0.10.0
libtpu: 0.0.40
codegen_flags: <defaults>
</compile_context>

<pallas_src>
import jax
import jax.numpy as jnp
from jax.experimental import pallas as pl
from jax.experimental.pallas import tpu as pltpu

_HP = jax.lax.Precision.HIGHEST


def _linear_attention_kernel(pair_ref, wqk_ref, bqk_ref, v_ref, out_ref):
    # pair_ref : [TM, D]   wqk_ref : [D, L]   bqk_ref : [1, L]   v_ref : [L, D]
    # scores == tau * (Q @ K^T), with the Q projection folded into wqk / bqk.
    scores = jnp.dot(pair_ref[...], wqk_ref[...],
                     preferred_element_type=jnp.float32,
                     precision=_HP) + bqk_ref[...]                 # [TM, L]

    # F.softmax(..., dim=1) over the label axis (row-wise -> N tiling is safe).
    m = jnp.max(scores, axis=-1, keepdims=True)
    e = jnp.exp(scores - m)
    w = e / jnp.sum(e, axis=-1, keepdims=True)

    # z = attention_weight @ V
    out_ref[...] = jnp.dot(w, v_ref[...],
                           preferred_element_type=jnp.float32,
                           precision=_HP).astype(out_ref.dtype)


def linear_attention_pallas(pair_emb, label_emb, params, tau=0.5, tm=512):
    """params: wq [D,D], bq [D], wk [D,C], bk [D], wv [D,C], bv [D]
    (PyTorch nn.Linear convention: y = x @ W^T + b).  `tm` is the N tile and
    should be a multiple of 8 when tm < N."""
    n, in_dim = pair_emb.shape

    # ---- N-independent prep (tiny, done once per call) ----------------------
    k = jnp.dot(label_emb, params["wk"].T, precision=_HP) + params["bk"]   # [L, D]
    v = jnp.dot(label_emb, params["wv"].T, precision=_HP) + params["bv"]   # [L, D]
    kt = k.T                                                               # [D, L]
    tau = jnp.float32(tau)
    # Fold Q projection and tau into the score projection:
    #   tau * ((x @ Wq^T + bq) @ K^T) == x @ (tau*Wq^T@K^T) + (tau*bq@K^T)
    wqk = tau * jnp.dot(params["wq"].T, kt, precision=_HP)                 # [D, L]
    bqk = tau * jnp.dot(params["bq"].reshape(1, in_dim), kt, precision=_HP)  # [1, L]
    num_labels = kt.shape[1]

    # ---- tiling over N -------------------------------------------------------
    tm = min(int(tm), n)
    grid = (pl.cdiv(n, tm),)

    def resident(shape):
        # Constant index_map -> stays VMEM-resident across all grid steps.
        nd = len(shape)
        return pl.BlockSpec(shape, lambda i: (0,) * nd)

    return pl.pallas_call(
        _linear_attention_kernel,
        out_shape=jax.ShapeDtypeStruct((n, in_dim), pair_emb.dtype),
        grid_spec=pltpu.PrefetchScalarGridSpec(
            num_scalar_prefetch=0,
            grid=grid,
            in_specs=[
                pl.BlockSpec((tm, in_dim), lambda i: (i, 0)),   # pair_emb tile
                resident((in_dim, num_labels)),                 # Wqk  [D, L]
                resident((1, num_labels)),                      # bqk  [1, L]
                resident((num_labels, in_dim)),                 # V    [L, D]
            ],
            out_specs=pl.BlockSpec((tm, in_dim), lambda i: (i, 0)),
        ),
        compiler_params=pltpu.CompilerParams(
            dimension_semantics=("parallel",)),
    )(pair_emb, wqk, bqk, v)


def linear_attention_ref(pair_emb, label_emb, params, tau=0.5):
    q = jnp.dot(pair_emb, params["wq"].T, precision=_HP) + params["bq"]
    k = jnp.dot(label_emb, params["wk"].T, precision=_HP) + params["bk"]
    v = jnp.dot(label_emb, params["wv"].T, precision=_HP) + params["bv"]
    scores = jnp.dot(q, k.T, precision=_HP) * tau
    w = jax.nn.softmax(scores, axis=1)
    return jnp.dot(w, v, precision=_HP)


if __name__ == "__main__":
    # Small shapes consistent with the module: in_dim=32, num_class=16,
    # 512 pair rows (-> 4 grid steps at TM=128), 16 label-embedding rows.
    N, IN_DIM, NUM_CLASS, L = 512, 32, 16, 16

    key = jax.random.PRNGKey(0)
    k_pair, k_label, k_wq, k_bq, k_wk, k_bk, k_wv, k_bv = jax.random.split(key, 8)

    pair_emb = jax.random.normal(k_pair, (N, IN_DIM), dtype=jnp.float32)
    label_emb = jax.random.normal(k_label, (L, NUM_CLASS), dtype=jnp.float32)

    # Deterministic parameter init (nn.Linear(in, out) convention: W [out, in]).
    def uinit(k, shape, fan_in):
        bound = 1.0 / jnp.sqrt(jnp.float32(fan_in))
        return jax.random.uniform(k, shape, jnp.float32, -bound, bound)

    params = {
        "wq": uinit(k_wq, (IN_DIM, IN_DIM), IN_DIM),
        "bq": uinit(k_bq, (IN_DIM,), IN_DIM),
        "wk": uinit(k_wk, (IN_DIM, NUM_CLASS), NUM_CLASS),
        "bk": uinit(k_bk, (IN_DIM,), NUM_CLASS),
        "wv": uinit(k_wv, (IN_DIM, NUM_CLASS), NUM_CLASS),
        "bv": uinit(k_bv, (IN_DIM,), NUM_CLASS),
    }

    z = linear_attention_pallas(pair_emb, label_emb, params, tau=0.5, tm=128)
    jax.block_until_ready(z)

    z_ref = linear_attention_ref(pair_emb, label_emb, params, tau=0.5)
    assert z.shape == (N, IN_DIM)
    assert jnp.allclose(z, z_ref, atol=2e-3, rtol=2e-3), float(
        jnp.max(jnp.abs(z - z_ref)))

    print("KERNEL_OK")
</pallas_src>

<mosaic_0001>
module attributes {stable_mosaic.version = 11 : i64} {
  func.func @_linear_attention_kernel(%arg0: i32, %arg1: memref<128x32xf32, #tpu.memory_space<vmem>>, %arg2: memref<32x16xf32, #tpu.memory_space<vmem>>, %arg3: memref<1x16xf32, #tpu.memory_space<vmem>>, %arg4: memref<16x32xf32, #tpu.memory_space<vmem>>, %arg5: memref<128x32xf32, #tpu.memory_space<vmem>>) attributes {dimension_semantics = [#tpu.dimension_semantics<parallel>], iteration_bounds = array<i64: 4>, scalar_prefetch = 0 : i64, scratch_operands = 0 : i64, tpu.core_type = #tpu.core_type<tc>, window_params = [{transform_indices = @transform_0, window_bounds = array<i64: 128, 32>}, {pipeline_mode = #tpu.pipeline_mode<synchronous>, transform_indices = @transform_1, window_bounds = array<i64: 32, 16>}, {pipeline_mode = #tpu.pipeline_mode<synchronous>, transform_indices = @transform_2, window_bounds = array<i64: 1, 16>}, {pipeline_mode = #tpu.pipeline_mode<synchronous>, transform_indices = @transform_3, window_bounds = array<i64: 16, 32>}, {transform_indices = @transform_4, window_bounds = array<i64: 128, 32>}]} {
    %c0 = arith.constant 0 : index
    %c0_0 = arith.constant 0 : index
    %0 = vector.load %arg1[%c0, %c0_0] : memref<128x32xf32, #tpu.memory_space<vmem>>, vector<128x32xf32>
    %c0_1 = arith.constant 0 : index
    %c0_2 = arith.constant 0 : index
    %1 = vector.load %arg2[%c0_1, %c0_2] : memref<32x16xf32, #tpu.memory_space<vmem>>, vector<32x16xf32>
    %cst = arith.constant dense<0.000000e+00> : vector<128x16xf32>
    %2 = tpu.matmul %0, %1, %cst {dimension_numbers = #tpu.dot_dimension_numbers<[1], [0], [0], [1], [0, 0, 1, 1], [], []>, precision = #tpu.contract_precision<fp32>} : vector<128x32xf32>, vector<32x16xf32>, vector<128x16xf32> -> vector<128x16xf32>
    %c0_3 = arith.constant 0 : index
    %c0_4 = arith.constant 0 : index
    %3 = vector.load %arg3[%c0_3, %c0_4] : memref<1x16xf32, #tpu.memory_space<vmem>>, vector<1x16xf32>
    %4 = vector.broadcast %3 : vector<1x16xf32> to vector<128x16xf32>
    %5 = arith.addf %2, %4 : vector<128x16xf32>
    %cst_5 = arith.constant dense<0xFF800000> : vector<128xf32>
    %6 = vector.multi_reduction <maximumf>, %5, %cst_5 [1] : vector<128x16xf32> to vector<128xf32>
    %7 = vector.shape_cast %6 : vector<128xf32> to vector<128x1xf32>
    %8 = vector.broadcast %7 : vector<128x1xf32> to vector<128x16xf32>
    %9 = arith.subf %5, %8 : vector<128x16xf32>
    %10 = math.exp %9 : vector<128x16xf32>
    %cst_6 = arith.constant dense<0.000000e+00> : vector<128xf32>
    %11 = vector.multi_reduction <add>, %10, %cst_6 [1] : vector<128x16xf32> to vector<128xf32>
    %12 = vector.shape_cast %11 : vector<128xf32> to vector<128x1xf32>
    %13 = vector.broadcast %12 : vector<128x1xf32> to vector<128x16xf32>
    %14 = arith.divf %10, %13 : vector<128x16xf32>
    %c0_7 = arith.constant 0 : index
    %c0_8 = arith.constant 0 : index
    %15 = vector.load %arg4[%c0_7, %c0_8] : memref<16x32xf32, #tpu.memory_space<vmem>>, vector<16x32xf32>
    %cst_9 = arith.constant dense<0.000000e+00> : vector<128x32xf32>
    %16 = tpu.matmul %14, %15, %cst_9 {dimension_numbers = #tpu.dot_dimension_numbers<[1], [0], [0], [1], [0, 0, 1, 1], [], []>, precision = #tpu.contract_precision<fp32>} : vector<128x16xf32>, vector<16x32xf32>, vector<128x32xf32> -> vector<128x32xf32>
    %c0_10 = arith.constant 0 : index
    %c0_11 = arith.constant 0 : index
    %17 = vector.load %arg5[%c0_10, %c0_11] : memref<128x32xf32, #tpu.memory_space<vmem>>, vector<128x32xf32>
    tpu.vector_store %arg5[%c0_10, %c0_11], %16 {strides = array<i32>} : memref<128x32xf32, #tpu.memory_space<vmem>>, vector<128x32xf32>,
    return
  }
  func.func @transform_0(%arg0: i32) -> (i32, i32) {
    %c0_i32 = arith.constant 0 : i32
    %c0_i32_0 = arith.constant 0 : i32
    return %arg0, %c0_i32 : i32, i32
  }
  func.func @transform_1(%arg0: i32) -> (i32, i32) {
    %c0_i32 = arith.constant 0 : i32
    %c0_i32_0 = arith.constant 0 : i32
    %c0_i32_1 = arith.constant 0 : i32
    return %c0_i32, %c0_i32_0 : i32, i32
  }
  func.func @transform_2(%arg0: i32) -> (i32, i32) {
    %c0_i32 = arith.constant 0 : i32
    %c0_i32_0 = arith.constant 0 : i32
    %c0_i32_1 = arith.constant 0 : i32
    return %c0_i32, %c0_i32_0 : i32, i32
  }
  func.func @transform_3(%arg0: i32) -> (i32, i32) {
    %c0_i32 = arith.constant 0 : i32
    %c0_i32_0 = arith.constant 0 : i32
    %c0_i32_1 = arith.constant 0 : i32
    return %c0_i32, %c0_i32_0 : i32, i32
  }
  func.func @transform_4(%arg0: i32) -> (i32, i32) {
    %c0_i32 = arith.constant 0 : i32
    %c0_i32_0 = arith.constant 0 : i32
    return %arg0, %c0_i32 : i32, i32
  }
}

</mosaic_0001>

<bundles_post_ra>
// kernel: tpu_custom_call.1
= control target key start
LH: loop header
LB: loop body
LE: loop exit
PB: predicated region body
PF: predicated region fallthrough
CT: control target
= control target key end

     0   :  { %s3515_s15 = smov 0   ;;  %s4687_s0 = inlined_call_operand.vmem [shape: f32[512,32], index: 0, kind: input, shape index: {}]   ;;  %s4688_s1 = inlined_call_operand.vmem [shape: f32[32,16], index: 1, kind: input, shape index: {}]   ;;  %s4689_s2 = inlined_call_operand.vmem [shape: f32[1,16], index: 2, kind: input, shape index: {}]   ;;  %s4690_s3 = inlined_call_operand.vmem [shape: f32[16,32], index: 3, kind: input, shape index: {}]   ;;  %s4691_s4 = inlined_call_operand.vmem [shape: f32[512,32], index: 4, kind: output, shape index: {}]  }
   0x1 LB: > { %s2810_s16 = sadd.s32 4294967295, %s3488_s15   ;;  %p2814_p0 = scmp.ge.s32.totalorder %s3488_s15, 1  ;;  %s3488_s15 = sphi %s3515_s15, %s14_s15  }
   0x2   : > { %p163_p1 = scmp.lt.s32.totalorder %s3488_s15, 5 }
   0x4   : > { %p164_p2 = pnand %p2814_p0, %p163_p1 }
   0x6   : > { %167 = sbr.rel (%p164_p2) target bundleno = 915 (0x393), region = 36 }
   0xb   : > { %v220_v0 = vld [vmem:[%s4688_s1 + $0x18] sm:$0xff]  ;;  %v219_v1 = vld [vmem:[%s4688_s1 + $0x10] sm:$0xff]  ;;  %v218_v2 = vld [vmem:[%s4688_s1 + $0x8] sm:$0xff]  ;;  %s2815_s23 = sshll.u32 %s2810_s16, 4  ;;  %vm228_vm0 = vcmask 261120   ;;  %vm1407_vm1 = vcmask 130048  }
   0xc   : > { %v3532_v3 = vand.u32 4294901760, %v220_v0  ;;  %v3534_v4 = vand.u32 4294901760, %v219_v1  ;;  %v3536_v5 = vand.u32 4294901760, %v218_v2  ;;  %v217_v6 = vld [vmem:[%s4688_s1] sm:$0xff]  ;;  %p190_p3 = scmp.lt.s32.totalorder %s2815_s23, 63 }
   0xd   : > { %v3541_v7 = vand.u32 4294901760, %v217_v6 }
   0xe   : > { %3050 = vmatprep.subr.mxu0 %v3532_v3  ;;  %v3545_v8 = vsub.f32 %v220_v0, %v3532_v3  ;;  %v3548_v9 = vsub.f32 %v219_v1, %v3534_v4  ;;  %v3551_v10 = vsub.f32 %v218_v2, %v3536_v5  ;;  %s4739_s23 = smov (!%p190_p3, %s2815_s23), 63 }
   0xf   : > { %3051 = vmatpush3.msra.mxu0 %v3532_v3  ;;  %v3557_v11 = vsub.f32 %v217_v6, %v3541_v7  ;;  %s2816_s26 = sshll.u32 %s4739_s23, 3 }
  0x10   : > { %v3560_v12 = vand.u32 4294901760, %v3545_v8  ;;  %3052 = vmatprep.subr.mxu0 %v3534_v4  ;;  %v3564_v13 = vand.u32 4294901760, %v3548_v9  ;;  %v3567_v14 = vand.u32 4294901760, %v3551_v10  ;;  %s3579_s29 = scalar_lea.vmem %s4687_s0, %s2816_s26  ;;  %s4609_s12 = scalar_lea.vmem %s4691_s4, %s2816_s26 }
  0x11   : > { %3053 = vmatpush3.msra.mxu0 %v3534_v4  ;;  %v3572_v15 = vand.u32 4294901760, %v3557_v11  ;;  %v201_v19 = vld [vmem:[%s3579_s29] sm:$0xff]  ;;  %v202_v20 = vld [vmem:[%s3579_s29 + $0x8] sm:$0xff]  ;;  %v203_v21 = vld [vmem:[%s3579_s29 + $0x10] sm:$0xff] }
  0x12   : > { %v534_v16 = vsub.f32 %v3545_v8, %v3560_v12  ;;  %v541_v17 = vsub.f32 %v3548_v9, %v3564_v13  ;;  %3054 = vmatprep.subr.mxu0 %v3536_v5  ;;  %v548_v18 = vsub.f32 %v3551_v10, %v3567_v14  ;;  %v230_v23 = vsel %vm228_vm0, %v201_v19, 0  ;;  %v204_v26 = vld [vmem:[%s3579_s29 + $0x18] sm:$0xff]  ;;  %v205_v27 = vld [vmem:[%s3579_s29 + $0x20] sm:$0xff]  ;;  %v206_v28 = vld [vmem:[%s3579_s29 + $0x28] sm:$0xff] }
  0x13   : > { %3055 = vmatpush3.msra.mxu0 %v3536_v5  ;;  %v555_v22 = vsub.f32 %v3557_v11, %v3572_v15  ;;  %v233_v24 = vsel %vm228_vm0, %v202_v20, 0  ;;  %v236_v25 = vsel %vm228_vm0, %v203_v21, 0  ;;  %v3601_v32 = vand.u32 4294901760, %v230_v23  ;;  %v207_v37 = vld [vmem:[%s3579_s29 + $0x30] sm:$0xff]  ;;  %v208_v38 = vld [vmem:[%s3579_s29 + $0x38] sm:$0xff]  ;;  %v209_v63 = vld [vmem:[%s3579_s29 + $0x40] sm:$0xff] }
  0x14   : > { %v535_v29 = vand.u32 4294901760, %v534_v16  ;;  %v542_v30 = vand.u32 4294901760, %v541_v17  ;;  %v549_v31 = vand.u32 4294901760, %v548_v18  ;;  %3056 = vmatprep.subr.mxu0 %v3541_v7  ;;  %v3604_v34 = vand.u32 4294901760, %v233_v24  ;;  %v210_v16 = vld [vmem:[%s3579_s29 + $0x48] sm:$0xff]  ;;  %v211_v21 = vld [vmem:[%s3579_s29 + $0x50] sm:$0xff] }
  0x15   : > { %3057 = vmatpush3.msra.mxu0 %v3541_v7  ;;  %v556_v33 = vand.u32 4294901760, %v555_v22  ;;  %v3606_v35 = vand.u32 4294901760, %v236_v25  ;;  %v239_v36 = vsel %vm228_vm0, %v204_v26, 0  ;;  %v3612_v39 = vsub.f32 %v230_v23, %v3601_v32  ;;  %3090 = vmatprep.mubr.f32.mxu1 %v3601_v32  ;;  %v213_v26 = vld [vmem:[%s3579_s29 + $0x60] sm:$0xff] }
  0x16   : > { %3082 = vmatprep.subr.mxu1 %v535_v29  ;;  %v3615_v40 = vand.u32 4294901760, %v239_v36  ;;  %v242_v41 = vsel %vm228_vm0, %v205_v27, 0  ;;  %v245_v42 = vsel %vm228_vm0, %v206_v28, 0  ;;  %3114 = vmatprep.subr.mxu0 %v3545_v8  ;;  %v3621_v43 = vsub.f32 %v233_v24, %v3604_v34 }
  0x17   : > { %3083 = vmatpush3.msra.mxu1 %v535_v29  ;;  %v3624_v44 = vsub.f32 %v236_v25, %v3606_v35  ;;  %v3626_v45 = vand.u32 4294901760, %v242_v41  ;;  %v3628_v46 = vand.u32 4294901760, %v245_v42  ;;  %v348_v47 = vand.u32 4294901760, %v3612_v39  ;;  %v212_v25 = vld [vmem:[%s3579_s29 + $0x58] sm:$0xff] }
  0x18   : > { %3084 = vmatprep.subr.mxu1 %v542_v30  ;;  %v3632_v48 = vsub.f32 %v239_v36, %v3615_v40  ;;  %v248_v49 = vsel %vm228_vm0, %v207_v37, 0  ;;  %v251_v50 = vsel %vm228_vm0, %v208_v38, 0  ;;  %v358_v51 = vand.u32 4294901760, %v3621_v43  ;;  %v214_v38 = vld [vmem:[%s3579_s29 + $0x68] sm:$0xff] }
  0x19   : > { %3085 = vmatpush3.msra.mxu1 %v542_v30  ;;  %v368_v52 = vand.u32 4294901760, %v3624_v44  ;;  %v3639_v53 = vsub.f32 %v242_v41, %v3626_v45  ;;  %v3642_v54 = vsub.f32 %v245_v42, %v3628_v46  ;;  %v349_v55 = vsub.f32 %v3612_v39, %v348_v47 }
  0x1a   : > { %3086 = vmatprep.subr.mxu1 %v549_v31  ;;  %v378_v56 = vand.u32 4294901760, %v3632_v48  ;;  %v3648_v57 = vand.u32 4294901760, %v248_v49  ;;  %v3650_v58 = vand.u32 4294901760, %v251_v50  ;;  %v359_v59 = vsub.f32 %v3621_v43, %v358_v51 }
  0x1b   : > { %3087 = vmatpush3.msra.mxu1 %v549_v31  ;;  %v369_v60 = vsub.f32 %v3624_v44, %v368_v52  ;;  %v388_v61 = vand.u32 4294901760, %v3639_v53  ;;  %v398_v62 = vand.u32 4294901760, %v3642_v54  ;;  %v350_v0 = vand.u32 4294901760, %v349_v55 }
  0x1c   : > { %3088 = vmatprep.subr.mxu1 %v556_v33  ;;  %v379_v1 = vsub.f32 %v3632_v48, %v378_v56  ;;  %v3665_v2 = vsub.f32 %v248_v49, %v3648_v57  ;;  %v3668_v6 = vsub.f32 %v251_v50, %v3650_v58  ;;  %v360_v17 = vand.u32 4294901760, %v359_v59  ;;  %v215_v50 = vld [vmem:[%s3579_s29 + $0x70] sm:$0xff] }
  0x1d   : > { %3089 = vmatpush3.msra.mxu1 %v556_v33  ;;  %v370_v18 = vand.u32 4294901760, %v369_v60  ;;  %v389_v19 = vsub.f32 %v3639_v53, %v388_v61  ;;  %v399_v20 = vsub.f32 %v3642_v54, %v398_v62  ;;  %3058 = vmatprep.mubr.f32.mxu0 %v350_v0  ;;  %v254_v24 = vsel %vm228_vm0, %v209_v63, 0 }
  0x1e   : > { %3091 = vmatmul.mubr.f32.vlgmr.msra.gmra.mxu1 %v3604_v34  ;;  %v408_v22 = vand.u32 4294901760, %v3665_v2  ;;  %v418_v23 = vand.u32 4294901760, %v3668_v6  ;;  %3059 = vmatmul.mubr.f32.vlgmr.msra.gmra.mxu0 %v360_v17  ;;  %v380_v27 = vand.u32 4294901760, %v379_v1  ;;  %v3685_v29 = vand.u32 4294901760, %v254_v24 }
  0x1f   : > { %3146 = vmatprep.subr.mxu1 %v3532_v3  ;;  %v390_v28 = vand.u32 4294901760, %v389_v19  ;;  %v257_v30 = vsel %vm228_vm0, %v210_v16, 0  ;;  %3115 = vmatpush3.msra.mxu0 %v3545_v8  ;;  %v400_v31 = vand.u32 4294901760, %v399_v20  ;;  %v260_v37 = vsel %vm228_vm0, %v211_v21, 0 }
  0x20   : > { %3147 = vmatpush3.msra.mxu1 %v3532_v3  ;;  %v409_v33 = vsub.f32 %v3665_v2, %v408_v22  ;;  %v3693_v36 = vand.u32 4294901760, %v257_v30  ;;  %3061 = vmatprep.mubr.f32.mxu0 %v370_v18  ;;  %v3699_v41 = vsub.f32 %v254_v24, %v3685_v29  ;;  %v3701_v42 = vand.u32 4294901760, %v260_v37  ;;  %v216_v18 = vld [vmem:[%s3579_s29 + $0x78] sm:$0xff] }
  0x21   : > { %3093 = vmatprep.mubr.f32.mxu1 %v3606_v35  ;;  %v263_v8 = vsel %vm228_vm0, %v212_v25, 0  ;;  %v266_v49 = vsel %vm228_vm0, %v213_v26, 0  ;;  %3116 = vmatprep.subr.mxu0 %v3548_v9  ;;  %v419_v59 = vsub.f32 %v3668_v6, %v418_v23  ;;  %v269_v17 = vsel %vm228_vm0, %v214_v38, 0 }
  0x22   : > { %3094 = vmatmul.mubr.f32.gmra.mxu1 %v3615_v40  ;;  %v410_v55 = vand.u32 4294901760, %v409_v33  ;;  %v3712_v60 = vsub.f32 %v257_v30, %v3693_v36  ;;  %v3714_v63 = vand.u32 4294901760, %v263_v8  ;;  %3062 = vmatmul.mubr.f32.gmra.mxu0 %v380_v27  ;;  %v428_v0 = vand.u32 4294901760, %v3699_v41 }
  0x23   : > { %3096 = vmatprep.mubr.f32.mxu1 %v3626_v45  ;;  %v3719_v1 = vsub.f32 %v260_v37, %v3701_v42  ;;  %v3721_v16 = vand.u32 4294901760, %v266_v49  ;;  %3064 = vmatprep.mubr.f32.mxu0 %v390_v28  ;;  %v3730_v21 = vand.u32 4294901760, %v269_v17  ;;  %v272_v24 = vsel %vm228_vm0, %v215_v50, 0 }
  0x24   : > { %3117 = vmatpush3.msra.mxu0 %v3548_v9  ;;  %v438_v19 = vand.u32 4294901760, %v3712_v60  ;;  %v3728_v20 = vsub.f32 %v263_v8, %v3714_v63  ;;  %3148 = vmatprep.subr.mxu1 %v3534_v4  ;;  %v429_v25 = vsub.f32 %v3699_v41, %v428_v0  ;;  %v3742_v27 = vand.u32 4294901760, %v272_v24 }
  0x25   : > { %3118 = vmatprep.subr.mxu0 %v3551_v10  ;;  %v448_v26 = vand.u32 4294901760, %v3719_v1  ;;  %v3740_v9 = vsub.f32 %v266_v49, %v3721_v16  ;;  %v420_v28 = vand.u32 4294901760, %v419_v59  ;;  %v275_v30 = vsel %vm228_vm0, %v216_v18, 0  ;;  %3149 = vmatpush3.msra.mxu1 %v3534_v4 }
  0x26   : > { %3097 = vmatmul.mubr.f32.gmra.mxu1 %v3628_v46  ;;  %3119 = vmatpush3.msra.mxu0 %v3551_v10  ;;  %v430_v33 = vand.u32 4294901760, %v429_v25  ;;  %v439_v37 = vsub.f32 %v3712_v60, %v438_v19  ;;  %v458_v38 = vand.u32 4294901760, %v3728_v20  ;;  %v3753_v8 = vsub.f32 %v269_v17, %v3730_v21 }
  0x27   : > { %3065 = vmatmul.mubr.f32.gmra.mxu0 %v400_v31  ;;  %3099 = vmatprep.mubr.f32.mxu1 %v3648_v57  ;;  %v449_v10 = vsub.f32 %v3719_v1, %v448_v26  ;;  %v468_v31 = vand.u32 4294901760, %v3740_v9  ;;  %v3761_v49 = vsub.f32 %v272_v24, %v3742_v27  ;;  %v3763_v50 = vand.u32 4294901760, %v275_v30 }
  0x28   : > { %3067 = vmatprep.mubr.f32.mxu0 %v410_v55  ;;  %3150 = vmatprep.subr.mxu1 %v3536_v5  ;;  %v440_v55 = vand.u32 4294901760, %v439_v37  ;;  %v459_v59 = vsub.f32 %v3728_v20, %v458_v38  ;;  %v478_v17 = vand.u32 4294901760, %v3753_v8 }
  0x29   : > { %3120 = vmatprep.subr.mxu0 %v3557_v11  ;;  %v3775_v18 = vsub.f32 %v275_v30, %v3763_v50  ;;  %3151 = vmatpush3.msra.mxu1 %v3536_v5  ;;  %v450_v24 = vand.u32 4294901760, %v449_v10  ;;  %v488_v25 = vand.u32 4294901760, %v3761_v49 }
  0x2a   : > { %3100 = vmatmul.mubr.f32.gmra.mxu1 %v3650_v58  ;;  %3121 = vmatpush3.msra.mxu0 %v3557_v11  ;;  %v469_v11 = vsub.f32 %v3740_v9, %v468_v31  ;;  %v479_v30 = vsub.f32 %v3753_v8, %v478_v17 }
  0x2b   : > { %3068 = vmatmul.mubr.f32.gmra.mxu0 %v420_v28  ;;  %3102 = vmatprep.mubr.f32.mxu1 %v3685_v29  ;;  %v460_v28 = vand.u32 4294901760, %v459_v59  ;;  %v489_v10 = vsub.f32 %v3761_v49, %v488_v25 }
  0x2c   : > { %3070 = vmatprep.mubr.f32.mxu0 %v430_v33  ;;  %3152 = vmatprep.subr.mxu1 %v3541_v7  ;;  %v498_v33 = vand.u32 4294901760, %v3775_v18  ;;  %v470_v37 = vand.u32 4294901760, %v469_v11 }
  0x2d   : > { %3178 = vmatprep.subr.mxu0 %v3560_v12  ;;  %3153 = vmatpush3.msra.mxu1 %v3541_v7 }
  0x2e   : > { %3103 = vmatmul.mubr.f32.gmra.mxu1 %v3693_v36  ;;  %3210 = vmatprep.subr.mxu1 %v3532_v3  ;;  %v499_v59 = vsub.f32 %v3775_v18, %v498_v33 }
  0x2f   : > { %3071 = vmatmul.mubr.f32.gmra.mxu0 %v440_v55  ;;  %3105 = vmatprep.mubr.f32.mxu1 %v3701_v42  ;;  %v480_v55 = vand.u32 4294901760, %v479_v30 }
  0x30   : > { %3073 = vmatprep.mubr.f32.mxu0 %v450_v24  ;;  %v490_v24 = vand.u32 4294901760, %v489_v10  ;;  %v500_v11 = vand.u32 4294901760, %v499_v59 }
  0x32   : > { %3106 = vmatmul.mubr.f32.gmra.mxu1 %v3714_v63 }
  0x33   : > { %3074 = vmatmul.mubr.f32.gmra.mxu0 %v460_v28  ;;  %3108 = vmatprep.mubr.f32.mxu1 %v3721_v16 }
  0x34   : > { %3076 = vmatprep.mubr.f32.mxu0 %v470_v37 }
  0x36   : > { %3109 = vmatmul.mubr.f32.gmra.mxu1 %v3730_v21 }
  0x37   : > { %3077 = vmatmul.mubr.f32.gmra.mxu0 %v480_v55  ;;  %3111 = vmatprep.mubr.f32.mxu1 %v3742_v27 }
  0x38   : > { %3079 = vmatprep.mubr.f32.mxu0 %v490_v24 }
  0x3a   : > { %3112 = vmatmul.mubr.f32.gmra.mxu1 %v3763_v50 }
  0x3b   : > { %3080 = vmatmul.mubr.f32.gmra.mxu0 %v500_v11  ;;  %3154 = vmatprep.mubr.f32.mxu1 %v348_v47 }
  0x3c   : > { %3122 = vmatprep.mubr.f32.mxu0 %v3612_v39 }
  0x3e   : > { %3155 = vmatmul.mubr.f32.vlgmr.msra.gmra.mxu1 %v358_v51 }
  0x3f   : > { %3123 = vmatmul.mubr.f32.vlgmr.msra.gmra.mxu0 %v3621_v43  ;;  %3211 = vmatpush3.msra.mxu1 %v3532_v3 }
  0x40   : > { %3179 = vmatpush3.msra.mxu0 %v3560_v12  ;;  %3125 = vmatprep.mubr.f32.mxu0 %v3624_v44 }
  0x41   : > { %3157 = vmatprep.mubr.f32.mxu1 %v368_v52  ;;  %3180 = vmatprep.subr.mxu0 %v3564_v13 }
  0x42   : > { %3158 = vmatmul.mubr.f32.gmra.mxu1 %v378_v56  ;;  %3181 = vmatpush3.msra.mxu0 %v3564_v13 }
  0x43   : > { %3126 = vmatmul.mubr.f32.gmra.mxu0 %v3632_v48  ;;  %3160 = vmatprep.mubr.f32.mxu1 %v388_v61 }
  0x44   : > { %3128 = vmatprep.mubr.f32.mxu0 %v3639_v53  ;;  %3212 = vmatprep.subr.mxu1 %v3534_v4 }
  0x45   : > { %3213 = vmatpush3.msra.mxu1 %v3534_v4  ;;  %3182 = vmatprep.subr.mxu0 %v3567_v14 }
  0x46   : > { %3161 = vmatmul.mubr.f32.gmra.mxu1 %v398_v62  ;;  %3183 = vmatpush3.msra.mxu0 %v3567_v14 }
  0x47   : > { %3129 = vmatmul.mubr.f32.gmra.mxu0 %v3642_v54  ;;  %3163 = vmatprep.mubr.f32.mxu1 %v408_v22 }
  0x48   : > { %3131 = vmatprep.mubr.f32.mxu0 %v3665_v2  ;;  %3214 = vmatprep.subr.mxu1 %v3536_v5 }
  0x49   : > { %3215 = vmatpush3.msra.mxu1 %v3536_v5  ;;  %3184 = vmatprep.subr.mxu0 %v3572_v15 }
  0x4a   : > { %3164 = vmatmul.mubr.f32.gmra.mxu1 %v418_v23  ;;  %3185 = vmatpush3.msra.mxu0 %v3572_v15 }
  0x4b   : > { %3132 = vmatmul.mubr.f32.gmra.mxu0 %v3668_v6  ;;  %3166 = vmatprep.mubr.f32.mxu1 %v428_v0 }
  0x4c   : > { %3134 = vmatprep.mubr.f32.mxu0 %v3699_v41  ;;  %3216 = vmatprep.subr.mxu1 %v3541_v7 }
  0x4d   : > { %3217 = vmatpush3.msra.mxu1 %v3541_v7 }
  0x4e   : > { %3167 = vmatmul.mubr.f32.gmra.mxu1 %v438_v19 }
  0x4f   : > { %3135 = vmatmul.mubr.f32.gmra.mxu0 %v3712_v60  ;;  %3169 = vmatprep.mubr.f32.mxu1 %v448_v26 }
  0x50   : > { %3137 = vmatprep.mubr.f32.mxu0 %v3719_v1 }
  0x52   : > { %3170 = vmatmul.mubr.f32.gmra.mxu1 %v458_v38 }
  0x53   : > { %3138 = vmatmul.mubr.f32.gmra.mxu0 %v3728_v20  ;;  %3172 = vmatprep.mubr.f32.mxu1 %v468_v31 }
  0x54   : > { %3140 = vmatprep.mubr.f32.mxu0 %v3740_v9 }
  0x56   : > { %3173 = vmatmul.mubr.f32.gmra.mxu1 %v478_v17 }
  0x57   : > { %3141 = vmatmul.mubr.f32.gmra.mxu0 %v3753_v8  ;;  %3175 = vmatprep.mubr.f32.mxu1 %v488_v25 }
  0x58   : > { %3143 = vmatprep.mubr.f32.mxu0 %v3761_v49 }
  0x5a   : > { %3176 = vmatmul.mubr.f32.gmra.mxu1 %v498_v33 }
  0x5b   : > { %3144 = vmatmul.mubr.f32.gmra.mxu0 %v3775_v18  ;;  %3218 = vmatprep.mubr.f32.mxu1 %v3601_v32  ;;  %v3976_v18 = vld [vmem:[%s4689_s2] ss:$0 sm:$0xff] }
  0x5c   : > { %3186 = vmatprep.mubr.f32.mxu0 %v3601_v32 }
  0x5e   : > { %3219 = vmatmul.mubr.f32.vlgmr.msra.gmra.mxu1 %v3604_v34 }
  0x5f   : > { %3187 = vmatmul.mubr.f32.vlgmr.msra.gmra.mxu0 %v3604_v34  ;;  %3221 = vmatprep.mubr.f32.mxu1 %v3606_v35 }
  0x60   : > { %3189 = vmatprep.mubr.f32.mxu0 %v3606_v35 }
  0x62   : > { %3222 = vmatmul.mubr.f32.gmra.mxu1 %v3615_v40 }
  0x63   : > { %3190 = vmatmul.mubr.f32.gmra.mxu0 %v3615_v40  ;;  %3224 = vmatprep.mubr.f32.mxu1 %v3626_v45 }
  0x64   : > { %3192 = vmatprep.mubr.f32.mxu0 %v3626_v45 }
  0x66   : > { %3225 = vmatmul.mubr.f32.gmra.mxu1 %v3628_v46 }
  0x67   : > { %3193 = vmatmul.mubr.f32.gmra.mxu0 %v3628_v46  ;;  %3227 = vmatprep.mubr.f32.mxu1 %v3648_v57 }
  0x68   : > { %3195 = vmatprep.mubr.f32.mxu0 %v3648_v57 }
  0x6a   : > { %3228 = vmatmul.mubr.f32.gmra.mxu1 %v3650_v58 }
  0x6b   : > { %3196 = vmatmul.mubr.f32.gmra.mxu0 %v3650_v58  ;;  %3230 = vmatprep.mubr.f32.mxu1 %v3685_v29 }
  0x6c   : > { %3198 = vmatprep.mubr.f32.mxu0 %v3685_v29 }
  0x6e   : > { %3231 = vmatmul.mubr.f32.gmra.mxu1 %v3693_v36 }
  0x6f   : > { %3199 = vmatmul.mubr.f32.gmra.mxu0 %v3693_v36  ;;  %3233 = vmatprep.mubr.f32.mxu1 %v3701_v42 }
  0x70   : > { %3201 = vmatprep.mubr.f32.mxu0 %v3701_v42 }
  0x72   : > { %3234 = vmatmul.mubr.f32.gmra.mxu1 %v3714_v63 }
  0x73   : > { %3202 = vmatmul.mubr.f32.gmra.mxu0 %v3714_v63  ;;  %3236 = vmatprep.mubr.f32.mxu1 %v3721_v16 }
  0x74   : > { %3204 = vmatprep.mubr.f32.mxu0 %v3721_v16 }
  0x76   : > { %3237 = vmatmul.mubr.f32.gmra.mxu1 %v3730_v21 }
  0x77   : > { %3205 = vmatmul.mubr.f32.gmra.mxu0 %v3730_v21  ;;  %3239 = vmatprep.mubr.f32.mxu1 %v3742_v27 }
  0x78   : > { %3207 = vmatprep.mubr.f32.mxu0 %v3742_v27 }
  0x7a   : > { %3240 = vmatmul.mubr.f32.gmra.mxu1 %v3763_v50 }
  0x7b   : > { %3208 = vmatmul.mubr.f32.gmra.mxu0 %v3763_v50 }
  0xde   : > { %v3897_v3 = vpop.f32.mrf.mxu1  ;;  %v3060_v4 = vpop.f32.mrf.mxu0 }
  0xdf   : > { %v363_v33 = vadd.f32 %v3060_v4, %v3976_v18 }
  0xe0   : > { %v593_v5 = vpop.f32.mrf.mxu1  ;;  %v352_v7 = vpop.f32.mrf.mxu0 }
  0xe1   : > { %v353_v37 = vadd.f32 %v3976_v18, %v352_v7  ;;  %v600_v11 = vadd.f32 %v3897_v3, %v363_v33 }
  0xe2   : > { %v3899_v12 = vpop.f32.mrf.mxu1  ;;  %v3063_v13 = vpop.f32.mrf.mxu0 }
  0xe4   : > { %v3901_v14 = vpop.f32.mrf.mxu1  ;;  %v372_v15 = vpop.f32.mrf.mxu0 }
  0xe6   : > { %v3903_v32 = vpop.f32.mrf.mxu1 }
  0xe7   : > { %v3905_v34 = vpop.f32.mrf.mxu0 }
  0xe8   : > { %v3907_v35 = vpop.f32.mrf.mxu1 }
  0xe9   : > { %v3909_v39 = vpop.f32.mrf.mxu0 }
  0xea   : > { %v3911_v40 = vpop.f32.mrf.mxu1 }
  0xeb   : > { %v3913_v43 = vpop.f32.mrf.mxu0 }
  0xec   : > { %v3915_v44 = vpop.f32.mrf.mxu1 }
  0xed   : > { %v3917_v45 = vpop.f32.mrf.mxu0 }
  0xee   : > { %v3919_v46 = vpop.f32.mrf.mxu1 }
  0xef   : > { %v3921_v47 = vpop.f32.mrf.mxu0 }
  0xf0   : > { %v3923_v48 = vpop.f32.mrf.mxu1 }
  0xf1   : > { %v3925_v51 = vpop.f32.mrf.mxu0 }
  0xf2   : > { %v3927_v52 = vpop.f32.mrf.mxu1 }
  0xf3   : > { %v3929_v53 = vpop.f32.mrf.mxu0 }
  0xf4   : > { %v3931_v54 = vpop.f32.mrf.mxu1 }
  0xf5   : > { %v3933_v56 = vpop.f32.mrf.mxu0 }
  0xf6   : > { %v3935_v57 = vpop.f32.mrf.mxu1 }
  0xf7   : > { %v3937_v58 = vpop.f32.mrf.mxu0 }
  0xf8   : > { %v3939_v61 = vpop.f32.mrf.mxu1 }
  0xf9   : > { %v3941_v62 = vpop.f32.mrf.mxu0 }
  0xfa   : > { %v3943_v2 = vpop.f32.mrf.mxu1 }
  0xfb   : > { %4692 = vst [vmem:[#allocation2_spill] sm:$0xff] %v3943_v2  ;;  %v3945_v6 = vpop.f32.mrf.mxu0  ;;  %v383_v2 = vadd.f32 %v3063_v13, %v3976_v18  ;;  %v393_v13 = vadd.f32 %v3976_v18, %v3909_v39 }
  0xfc   : > { %v3947_v22 = vpop.f32.mrf.mxu1 }
  0xfd   : > { %4693 = vst [vmem:[#allocation3_spill] sm:$0xff] %v3947_v22  ;;  %v3949_v23 = vpop.f32.mrf.mxu0  ;;  %v594_v22 = vadd.f32 %v593_v5, %v353_v37  ;;  %v612_v3 = vadd.f32 %v3899_v12, %v383_v2  ;;  %v413_v12 = vadd.f32 %v3976_v18, %v3917_v45 }
  0xfe   : > { %4694 = vst [vmem:[#allocation4_spill] sm:$0xff] %v3949_v23  ;;  %v3156_v29 = vpop.f32.mrf.mxu1 }
  0xff   : > { %v3124_v36 = vpop.f32.mrf.mxu0  ;;  %v630_v45 = vadd.f32 %v3915_v44, %v413_v12 }
 0x100   : > { %v945_v41 = vpop.f32.mrf.mxu1  ;;  %v771_v7 = vadd.f32 %v3124_v36, %v600_v11 }
 0x101   : > { %v763_v42 = vpop.f32.mrf.mxu0 }
 0x102   : > { %v3159_v60 = vpop.f32.mrf.mxu1  ;;  %v764_v23 = vadd.f32 %v763_v42, %v594_v22  ;;  %v954_v37 = vadd.f32 %v3156_v29, %v771_v7 }
 0x103   : > { %v3127_v63 = vpop.f32.mrf.mxu0 }
 0x104   : > { %v961_v0 = vpop.f32.mrf.mxu1  ;;  %v785_v36 = vadd.f32 %v3127_v63, %v612_v3 }
 0x105   : > { %v777_v1 = vpop.f32.mrf.mxu0 }
 0x106   : > { %v3951_v16 = vpop.f32.mrf.mxu1  ;;  %v970_v63 = vadd.f32 %v3159_v60, %v785_v36  ;;  %v463_v36 = vadd.f32 %v3929_v53, %v3976_v18 }
 0x107   : > { %v3130_v19 = vpop.f32.mrf.mxu0 }
 0x108   : > { %v3953_v20 = vpop.f32.mrf.mxu1 }
 0x109   : > { %v791_v21 = vpop.f32.mrf.mxu0 }
 0x10a   : > { %v3955_v26 = vpop.f32.mrf.mxu1 }
 0x10b   : > { %v3957_v9 = vpop.f32.mrf.mxu0 }
 0x10c   : > { %v3959_v27 = vpop.f32.mrf.mxu1 }
 0x10d   : > { %v3961_v38 = vpop.f32.mrf.mxu0 }
 0x10e   : > { %v3963_v8 = vpop.f32.mrf.mxu1 }
 0x10f   : > { %v3965_v31 = vpop.f32.mrf.mxu0 }
 0x110   : > { %v3967_v49 = vpop.f32.mrf.mxu1 }
 0x111   : > { %v3969_v50 = vpop.f32.mrf.mxu0 }
 0x112   : > { %v3971_v17 = vpop.f32.mrf.mxu1 }
 0x113   : > { %4695 = vst [vmem:[#allocation5_spill] sm:$0xff] %v3971_v17  ;;  %v3978_v25 = vpop.f32.mrf.mxu0 }
 0x114   : > { %v3980_v28 = vpop.f32.mrf.mxu1 }
 0x115   : > { %4696 = vst [vmem:[#allocation6_spill] sm:$0xff] %v3980_v28  ;;  %v3982_v30 = vpop.f32.mrf.mxu0  ;;  %v373_v28 = vadd.f32 %v3976_v18, %v372_v15 }
 0x116   : > { %v3986_v10 = vpop.f32.mrf.mxu1 }
 0x117   : > { %4697 = vst [vmem:[#allocation7_spill] sm:$0xff] %v3986_v10  ;;  %v3988_v55 = vpop.f32.mrf.mxu0  ;;  %v606_v5 = vadd.f32 %v3901_v14, %v373_v28  ;;  %v618_v14 = vadd.f32 %v3907_v35, %v393_v13  ;;  %v433_v35 = vadd.f32 %v3976_v18, %v3925_v51  ;;  %v806_v13 = vadd.f32 %v3961_v38, %v630_v45 }
 0x118   : > { %4698 = vst [vmem:[#allocation8_spill] sm:$0xff] %v3988_v55  ;;  %v3990_v59 = vpop.f32.mrf.mxu1 }
 0x119   : > { %4699 = vst [vmem:[#allocation9_spill] sm:$0xff] %v3990_v59  ;;  %v3992_v24 = vpop.f32.mrf.mxu0  ;;  %v403_v59 = vadd.f32 %v3905_v34, %v3976_v18  ;;  %v778_v22 = vadd.f32 %v777_v1, %v606_v5  ;;  %v423_v34 = vadd.f32 %v3913_v43, %v3976_v18 }
 0x11a   : > { %v3997_v17 = vpop.f32.mrf.mxu1 }
 0x11b   : > { %4700 = vst [vmem:[#allocation10_spill] sm:$0xff] %v3997_v17  ;;  %v3999_v4 = vpop.f32.mrf.mxu0  ;;  %v946_v17 = vadd.f32 %v945_v41, %v764_v23  ;;  %v624_v11 = vadd.f32 %v3903_v32, %v403_v59  ;;  %v443_v23 = vadd.f32 %v3921_v47, %v3976_v18  ;;  %v962_v1 = vadd.f32 %v961_v0, %v778_v22 }
 0x11c   : > { %v4001_v10 = vpop.f32.mrf.mxu1  ;;  %v792_v32 = vadd.f32 %v791_v21, %v618_v14  ;;  %v636_v7 = vadd.f32 %v3911_v40, %v423_v34 }
 0x11d   : > { %4701 = vst [vmem:[#allocation11_spill] sm:$0xff] %v4001_v10  ;;  %v4005_v55 = vpop.f32.mrf.mxu0  ;;  %v799_v29 = vadd.f32 %v3130_v19, %v624_v11  ;;  %v648_v44 = vadd.f32 %v3919_v46, %v443_v23 }
 0x11e   : > { %v3220_v15 = vpop.f32.mrf.mxu1  ;;  %v813_v5 = vadd.f32 %v3957_v9, %v636_v7  ;;  %v978_v51 = vadd.f32 %v3953_v20, %v792_v32 }
 0x11f   : > { %v3188_v33 = vpop.f32.mrf.mxu0  ;;  %v986_v21 = vadd.f32 %v3951_v16, %v799_v29  ;;  %v453_v16 = vadd.f32 %v3976_v18, %v3933_v56  ;;  %v994_v56 = vadd.f32 %v3959_v27, %v806_v13 }
 0x120   : > { %v1313_v42 = vpop.f32.mrf.mxu1  ;;  %v1155_v28 = vadd.f32 %v3188_v33, %v954_v37  ;;  %v642_v37 = vadd.f32 %v3923_v48, %v433_v35  ;;  %v483_v48 = vadd.f32 %v3937_v58, %v3976_v18  ;;  %v1002_v53 = vadd.f32 %v3955_v26, %v813_v5 }
 0x121   : > { %v1148_v2 = vpop.f32.mrf.mxu0  ;;  %v473_v58 = vadd.f32 %v3976_v18, %v3941_v62  ;;  %v503_v35 = vadd.f32 %v3945_v6, %v3976_v18 }
 0x122   : > { %v1149_v39 = vadd.f32 %v1148_v2, %v946_v17  ;;  %v3223_v10 = vpop.f32.mrf.mxu1  ;;  %v4025_v3 = vadd.f32 %v3220_v15, %v1155_v28  ;;  %v820_v12 = vadd.f32 %v3969_v50, %v642_v37  ;;  %v660_v28 = vadd.f32 %v3927_v52, %v463_v36  ;;  %v4707_v36 = vld [vmem:[#allocation3_spill] sm:$0xff] }
 0x123   : > { %v3191_v41 = vpop.f32.mrf.mxu0  ;;  %v666_v45 = vadd.f32 %v3939_v61, %v473_v58 }
 0x124   : > { %v4019_v59 = vadd.f32 %v1313_v42, %v1149_v39  ;;  %v1325_v43 = vpop.f32.mrf.mxu1  ;;  %v1167_v47 = vadd.f32 %v3191_v41, %v970_v63  ;;  %v1411_v38 = vsel %vm1407_vm1, %v4025_v3, -inf  ;;  %v654_v39 = vadd.f32 %v3931_v54, %v453_v16 }
 0x125   : > { %v1160_v17 = vpop.f32.mrf.mxu0  ;;  %v672_v63 = vadd.f32 %v3935_v57, %v483_v48  ;;  %v841_v52 = vadd.f32 %v3978_v25, %v660_v28  ;;  %v4702_v57 = vld [vmem:[#allocation4_spill] sm:$0xff] }
 0x126   : > { %v1161_v19 = vadd.f32 %v1160_v17, %v962_v1  ;;  %v1408_v60 = vsel %vm1407_vm1, %v4019_v59, -inf  ;;  %v3226_v0 = vpop.f32.mrf.mxu1  ;;  %v4041_v42 = vadd.f32 %v3223_v10, %v1167_v47  ;;  %v827_v10 = vadd.f32 %v3965_v31, %v648_v44 }
 0x127   : > { %v3194_v40 = vpop.f32.mrf.mxu0  ;;  %1409 = vmax.xlane.f32.xlu0 %v1408_v60  ;;  %v1010_v1 = vadd.f32 %v3967_v49, %v820_v12  ;;  %v834_v32 = vadd.f32 %v3982_v30, %v654_v39  ;;  %v493_v25 = vadd.f32 %v3976_v18, %v4702_v57  ;;  %v4705_v18 = vld [vmem:[#allocation6_spill] sm:$0xff]  ;;  %v848_v44 = vadd.f32 %v3992_v24, %v666_v45  ;;  %v4708_v24 = vld [vmem:[#allocation7_spill] sm:$0xff] }
 0x128   : > { %v4034_v15 = vadd.f32 %v1325_v43, %v1161_v19  ;;  %v1337_v33 = vpop.f32.mrf.mxu1  ;;  %v1179_v9 = vadd.f32 %v3194_v40, %v986_v21  ;;  %v1417_v27 = vsel %vm1407_vm1, %v4041_v42, -inf  ;;  %v1018_v62 = vadd.f32 %v3963_v8, %v827_v10  ;;  %v4704_v21 = vld [vmem:[#allocation8_spill] sm:$0xff] }
 0x129   : > { %v1172_v22 = vpop.f32.mrf.mxu0  ;;  %v855_v5 = vadd.f32 %v4704_v21, %v672_v63  ;;  %v1026_v40 = vadd.f32 %v4705_v18, %v834_v32  ;;  %v678_v16 = vadd.f32 %v4707_v36, %v493_v25 }
 0x12a   : > { %v1173_v46 = vadd.f32 %v1172_v22, %v978_v51  ;;  %v1414_v20 = vsel %vm1407_vm1, %v4034_v15, -inf  ;;  %v3229_v11 = vpop.f32.mrf.mxu1  ;;  %v4059_v26 = vadd.f32 %v3226_v0, %v1179_v9  ;;  %v4703_v0 = vld [vmem:[#allocation5_spill] sm:$0xff] }
 0x12b   : > { %v3197_v34 = vpop.f32.mrf.mxu0  ;;  %1415 = vmax.xlane.f32.xlu1 %v1414_v20  ;;  %1412 = vmax.xlane.f32.xlu0 %v1411_v38  ;;  %v1034_v61 = vadd.f32 %v4703_v0, %v841_v52  ;;  %v4711_v52 = vld [vmem:[#allocation11_spill] sm:$0xff] }
 0x12c   : > { %v4053_v2 = vadd.f32 %v1337_v33, %v1173_v46  ;;  %v1349_v14 = vpop.f32.mrf.mxu1  ;;  %v1191_v29 = vadd.f32 %v3197_v34, %v1002_v53  ;;  %v1423_v47 = vsel %vm1407_vm1, %v4059_v26, -inf  ;;  %v4706_v33 = vld [vmem:[#allocation2_spill] sm:$0xff]  ;;  %v1050_v53 = vadd.f32 %v4708_v24, %v855_v5 }
 0x12d   : > { %v1184_v23 = vpop.f32.mrf.mxu0  ;;  %v684_v37 = vadd.f32 %v4706_v33, %v503_v35 }
 0x12e   : > { %v1185_v41 = vadd.f32 %v1184_v23, %v994_v56  ;;  %v1420_v31 = vsel %vm1407_vm1, %v4053_v2, -inf  ;;  %v3232_v50 = vpop.f32.mrf.mxu1  ;;  %v4079_v8 = vadd.f32 %v3229_v11, %v1191_v29  ;;  %v4709_v56 = vld [vmem:[#allocation9_spill] sm:$0xff] }
 0x12f   : > { %v3200_v54 = vpop.f32.mrf.mxu0  ;;  %1418 = vmax.xlane.f32.xlu1 %v1417_v27  ;;  %1421 = vmax.xlane.f32.xlu0 %v1420_v31  ;;  %v1042_v10 = vadd.f32 %v4709_v56, %v848_v44  ;;  %v869_v12 = vadd.f32 %v3999_v4, %v684_v37  ;;  %v4710_v4 = vld [vmem:[#allocation10_spill] sm:$0xff] }
 0x130   : > { %v4070_v43 = vadd.f32 %v1349_v14, %v1185_v41  ;;  %v1361_v7 = vpop.f32.mrf.mxu1  ;;  %v1203_v49 = vadd.f32 %v3200_v54, %v1018_v62  ;;  %v1429_v38 = vsel %vm1407_vm1, %v4079_v8, -inf  ;;  %v862_v14 = vadd.f32 %v4005_v55, %v678_v16 }
 0x131   : > { %v1196_v17 = vpop.f32.mrf.mxu0  ;;  %v1066_v55 = vadd.f32 %v4710_v4, %v869_v12 }
 0x132   : > { %v1197_v19 = vadd.f32 %v1196_v17, %v1010_v1  ;;  %v1426_v30 = vsel %vm1407_vm1, %v4070_v43, -inf  ;;  %v3235_v60 = vpop.f32.mrf.mxu1  ;;  %v4091_v46 = vadd.f32 %v3232_v50, %v1203_v49  ;;  %v1058_v54 = vadd.f32 %v4711_v52, %v862_v14 }
 0x133   : > { %v3203_v6 = vpop.f32.mrf.mxu0  ;;  %1424 = vmax.xlane.f32.xlu1 %v1423_v47  ;;  %1427 = vmax.xlane.f32.xlu0 %v1426_v30 }
 0x134   : > { %v4087_v51 = vadd.f32 %v1361_v7, %v1197_v19  ;;  %v1373_v13 = vpop.f32.mrf.mxu1  ;;  %v1215_v9 = vadd.f32 %v3203_v6, %v1034_v61  ;;  %v1435_v27 = vsel %vm1407_vm1, %v4091_v46, -inf }
 0x135   : > { %v1208_v22 = vpop.f32.mrf.mxu0 }
 0x136   : > { %v1209_v20 = vadd.f32 %v1208_v22, %v1026_v40  ;;  %v1432_v11 = vsel %vm1407_vm1, %v4087_v51, -inf  ;;  %v3238_v48 = vpop.f32.mrf.mxu1  ;;  %v4103_v58 = vadd.f32 %v3235_v60, %v1215_v9  ;;  %v4132_v60 = vld [vmem:[%s4690_s3 + $0x8] sm:$0xff] }
 0x137   : > { %v3206_v34 = vpop.f32.mrf.mxu0  ;;  %1430 = vmax.xlane.f32.xlu1 %v1429_v38  ;;  %1433 = vmax.xlane.f32.xlu0 %v1432_v11  ;;  %v4135_v0 = vand.u32 4294901760, %v4132_v60 }
 0x138   : > { %v4101_v28 = vadd.f32 %v1373_v13, %v1209_v20  ;;  %v1385_v39 = vpop.f32.mrf.mxu1  ;;  %v1227_v29 = vadd.f32 %v3206_v34, %v1050_v53  ;;  %v1441_v7 = vsel %vm1407_vm1, %v4103_v58, -inf }
 0x139   : > { %v1220_v23 = vpop.f32.mrf.mxu0  ;;  %3242 = vmatprep.subr.mxu0 %v4135_v0 }
 0x13a   : > { %v1221_v41 = vadd.f32 %v1220_v23, %v1042_v10  ;;  %v1438_v31 = vsel %vm1407_vm1, %v4101_v28, -inf  ;;  %v3241_v50 = vpop.f32.mrf.mxu1  ;;  %v4115_v45 = vadd.f32 %v3238_v48, %v1227_v29  ;;  %3243 = vmatpush3.msra.mxu0 %v4135_v0 }
 0x13b   : > { %v3209_v63 = vpop.f32.mrf.mxu0  ;;  %1436 = vmax.xlane.f32.xlu1 %v1435_v27  ;;  %1439 = vmax.xlane.f32.xlu0 %v1438_v31 }
 0x13c   : > { %v4111_v62 = vadd.f32 %v1385_v39, %v1221_v41  ;;  %v1397_v32 = vpop.f32.mrf.mxu1  ;;  %v1239_v35 = vadd.f32 %v3209_v63, %v1066_v55  ;;  %v1447_v49 = vsel %vm1407_vm1, %v4115_v45, -inf }
 0x13d   : > { %v1232_v1 = vpop.f32.mrf.mxu0 }
 0x13e   : > { %v1233_v57 = vadd.f32 %v1232_v1, %v1058_v54  ;;  %v1444_v25 = vsel %vm1407_vm1, %v4111_v62, -inf  ;;  %v4121_v47 = vadd.f32 %v3241_v50, %v1239_v35 }
 0x13f   : > { %1442 = vmax.xlane.f32.xlu1 %v1441_v7  ;;  %1445 = vmax.xlane.f32.xlu0 %v1444_v25 }
 0x140   : > { %v4119_v17 = vadd.f32 %v1397_v32, %v1233_v57  ;;  %v1453_v30 = vsel %vm1407_vm1, %v4121_v47, -inf  ;;  %v4178_v57 = vsub.f32 %v4132_v60, %v4135_v0 }
 0x142   : > { %v1450_v19 = vsel %vm1407_vm1, %v4119_v17, -inf }
 0x143   : > { %1448 = vmax.xlane.f32.xlu1 %v1447_v49  ;;  %1451 = vmax.xlane.f32.xlu0 %v1450_v19 }
 0x147   : > { %1454 = vmax.xlane.f32.xlu1 %v1453_v30 }
 0x1b0   : > { %v1410_v61 = vpop.xlane.xlu0 %1409 }
 0x1b1   : > { %v1456_v21 = vsub.f32 %v4019_v59, %v1410_v61 }
 0x1b3   : > { %v1472_v5 = vmul.f32 1.442695, %v1456_v21 }
 0x1b4   : > { %v1416_v6 = vpop.xlane.xlu1 %1415  ;;  %v1413_v18 = vpop.xlane.xlu0 %1412 }
 0x1b5   : > { %3418 = vpow2.f32 %v1472_v5  ;;  %v1458_v40 = vsub.f32 %v4034_v15, %v1416_v6  ;;  %v1457_v44 = vsub.f32 %v4025_v3, %v1413_v18 }
 0x1b7   : > { %v1476_v13 = vmul.f32 1.442695, %v1458_v40  ;;  %v1474_v33 = vmul.f32 1.442695, %v1457_v44 }
 0x1b8   : > { %v1419_v37 = vpop.xlane.xlu1 %1418  ;;  %v1422_v36 = vpop.xlane.xlu0 %1421 }
 0x1b9   : > { %3420 = vpow2.f32 %v1476_v13  ;;  %v1459_v16 = vsub.f32 %v4041_v42, %v1419_v37  ;;  %v1460_v9 = vsub.f32 %v4053_v2, %v1422_v36 }
 0x1ba   : > { %3422 = vpow2.f32 %v1474_v33 }
 0x1bb   : > { %v1478_v22 = vmul.f32 1.442695, %v1459_v16  ;;  %v1480_v59 = vmul.f32 1.442695, %v1460_v9  ;;  %v1584_v9 = vld [vmem:[%s4690_s3] sm:$0xff] }
 0x1bc   : > { %v1425_v20 = vpop.xlane.xlu1 %1424  ;;  %v1428_v38 = vpop.xlane.xlu0 %1427 }
 0x1bd   : > { %3424 = vpow2.f32 %v1478_v22  ;;  %v1461_v11 = vsub.f32 %v4059_v26, %v1425_v20  ;;  %v1462_v15 = vsub.f32 %v4070_v43, %v1428_v38  ;;  %v4217_v20 = vand.u32 4294901760, %v1584_v9 }
 0x1be   : > { %3426 = vpow2.f32 %v1480_v59 }
 0x1bf   : > { %v1482_v3 = vmul.f32 1.442695, %v1461_v11  ;;  %v1484_v48 = vmul.f32 1.442695, %v1462_v15  ;;  %v4222_v11 = vsub.f32 %v1584_v9, %v4217_v20  ;;  %3244 = vmatprep.subr.mxu0 %v4217_v20 }
 0x1c0   : > { %v1431_v24 = vpop.xlane.xlu1 %1430  ;;  %v1434_v53 = vpop.xlane.xlu0 %1433  ;;  %3245 = vmatpush3.msra.mxu0 %v4217_v20 }
 0x1c1   : > { %3428 = vpow2.f32 %v1482_v3  ;;  %v1463_v42 = vsub.f32 %v4079_v8, %v1431_v24  ;;  %v1464_v2 = vsub.f32 %v4087_v51, %v1434_v53  ;;  %v4233_v24 = vand.u32 4294901760, %v4222_v11  ;;  %3298 = vmatprep.subr.mxu0 %v4178_v57 }
 0x1c2   : > { %v4148_v34 = vpop.eup %3418  ;;  %3430 = vpow2.f32 %v1484_v48 }
 0x1c3   : > { %v1486_v56 = vmul.f32 1.442695, %v1463_v42  ;;  %v1488_v10 = vmul.f32 1.442695, %v1464_v2  ;;  %v1504_v26 = vsel %vm1407_vm1, %v4148_v34, 0.0  ;;  %v1900_v42 = vsub.f32 %v4222_v11, %v4233_v24 }
 0x1c4   : > { %v1437_v12 = vpop.xlane.xlu1 %1436  ;;  %1505 = vadd.xlane.f32.xlu0 %v1504_v26  ;;  %v1440_v43 = vpop.xlane.xlu0 %1439 }
 0x1c5   : > { %3432 = vpow2.f32 %v1486_v56  ;;  %v1465_v14 = vsub.f32 %v4091_v46, %v1437_v12  ;;  %v1466_v39 = vsub.f32 %v4101_v28, %v1440_v43 }
 0x1c6   : > { %v4154_v23 = vpop.eup %3420  ;;  %3434 = vpow2.f32 %v1488_v10  ;;  %v1901_v10 = vand.u32 4294901760, %v1900_v42 }
 0x1c7   : > { %v4156_v8 = vpop.eup %3422  ;;  %v1490_v51 = vmul.f32 1.442695, %v1465_v14  ;;  %v1492_v29 = vmul.f32 1.442695, %v1466_v39  ;;  %v1510_v41 = vsel %vm1407_vm1, %v4154_v23, 0.0 }
 0x1c8   : > { %v1443_v27 = vpop.xlane.xlu1 %1442  ;;  %1511 = vadd.xlane.f32.xlu0 %v1510_v41  ;;  %v1507_v31 = vsel %vm1407_vm1, %v4156_v8, 0.0  ;;  %v1446_v50 = vpop.xlane.xlu0 %1445 }
 0x1c9   : > { %3436 = vpow2.f32 %v1490_v51  ;;  %v1467_v46 = vsub.f32 %v4103_v58, %v1443_v27  ;;  %1508 = vadd.xlane.f32.xlu1 %v1507_v31  ;;  %v1468_v28 = vsub.f32 %v4111_v62, %v1446_v50 }
 0x1ca   : > { %v4164_v63 = vpop.eup %3424  ;;  %3438 = vpow2.f32 %v1492_v29 }
 0x1cb   : > { %v4166_v4 = vpop.eup %3426  ;;  %v1494_v55 = vmul.f32 1.442695, %v1467_v46  ;;  %v1496_v52 = vmul.f32 1.442695, %v1468_v28  ;;  %v1513_v54 = vsel %vm1407_vm1, %v4164_v63, 0.0 }
 0x1cc   : > { %v1449_v1 = vpop.xlane.xlu1 %1448  ;;  %v1516_v32 = vsel %vm1407_vm1, %v4166_v4, 0.0  ;;  %v1452_v7 = vpop.xlane.xlu0 %1451 }
 0x1cd   : > { %3440 = vpow2.f32 %v1494_v55  ;;  %v1469_v58 = vsub.f32 %v4115_v45, %v1449_v1  ;;  %1514 = vadd.xlane.f32.xlu1 %v1513_v54  ;;  %1517 = vadd.xlane.f32.xlu0 %v1516_v32  ;;  %v1470_v62 = vsub.f32 %v4119_v17, %v1452_v7  ;;  %v4187_v17 = vand.u32 4294901760, %v4178_v57 }
 0x1ce   : > { %v4174_v35 = vpop.eup %3428  ;;  %3442 = vpow2.f32 %v1496_v52 }
 0x1cf   : > { %v4180_v25 = vpop.eup %3430  ;;  %v1498_v49 = vmul.f32 1.442695, %v1469_v58  ;;  %v1500_v19 = vmul.f32 1.442695, %v1470_v62  ;;  %v1519_v30 = vsel %vm1407_vm1, %v4174_v35, 0.0  ;;  %v1893_v5 = vsub.f32 %v4178_v57, %v4187_v17 }
 0x1d0   : > { %v1455_v61 = vpop.xlane.xlu1 %1454  ;;  %v1522_v45 = vsel %vm1407_vm1, %v4180_v25, 0.0 }
 0x1d1   : > { %3444 = vpow2.f32 %v1498_v49  ;;  %v1471_v21 = vsub.f32 %v4121_v47, %v1455_v61  ;;  %1520 = vadd.xlane.f32.xlu1 %v1519_v30  ;;  %1523 = vadd.xlane.f32.xlu0 %v1522_v45  ;;  %v1894_v13 = vand.u32 4294901760, %v1893_v5 }
 0x1d2   : > { %v4190_v60 = vpop.eup %3432  ;;  %3446 = vpow2.f32 %v1500_v19 }
 0x1d3   : > { %v4194_v6 = vpop.eup %3434  ;;  %v1502_v18 = vmul.f32 1.442695, %v1471_v21  ;;  %v1525_v40 = vsel %vm1407_vm1, %v4190_v60, 0.0  ;;  %3270 = vmatprep.subr.mxu1 %v1894_v13 }
 0x1d4   : > { %v1528_v44 = vsel %vm1407_vm1, %v4194_v6, 0.0  ;;  %3271 = vmatpush3.msra.mxu1 %v1894_v13 }
 0x1d5   : > { %3448 = vpow2.f32 %v1502_v18  ;;  %1526 = vadd.xlane.f32.xlu1 %v1525_v40  ;;  %1529 = vadd.xlane.f32.xlu0 %v1528_v44 }
 0x1d6   : > { %v4200_v47 = vpop.eup %3436  ;;  %3272 = vmatprep.subr.mxu1 %v1901_v10 }
 0x1d7   : > { %v4202_v33 = vpop.eup %3438  ;;  %v1531_v37 = vsel %vm1407_vm1, %v4200_v47, 0.0  ;;  %3273 = vmatpush3.msra.mxu1 %v1901_v10 }
 0x1d8   : > { %v1534_v36 = vsel %vm1407_vm1, %v4202_v33, 0.0  ;;  %3326 = vmatprep.subr.mxu1 %v4135_v0 }
 0x1d9   : > { %1532 = vadd.xlane.f32.xlu1 %v1531_v37  ;;  %1535 = vadd.xlane.f32.xlu0 %v1534_v36 }
 0x1da   : > { %v4208_v16 = vpop.eup %3440 }
 0x1db   : > { %v4213_v22 = vpop.eup %3442  ;;  %v1537_v59 = vsel %vm1407_vm1, %v4208_v16, 0.0 }
 0x1dc   : > { %v1540_v38 = vsel %vm1407_vm1, %v4213_v22, 0.0 }
 0x1dd   : > { %1538 = vadd.xlane.f32.xlu1 %v1537_v59  ;;  %1541 = vadd.xlane.f32.xlu0 %v1540_v38 }
 0x1de   : > { %v4224_v15 = vpop.eup %3444 }
 0x1df   : > { %v4227_v3 = vpop.eup %3446  ;;  %v1543_v48 = vsel %vm1407_vm1, %v4224_v15, 0.0 }
 0x1e0   : > { %v1546_v53 = vsel %vm1407_vm1, %v4227_v3, 0.0 }
 0x1e1   : > { %1544 = vadd.xlane.f32.xlu1 %v1543_v48  ;;  %1547 = vadd.xlane.f32.xlu0 %v1546_v53 }
 0x1e2   : > { %v4240_v2 = vpop.eup %3448 }
 0x1e3   : > { %v1549_v56 = vsel %vm1407_vm1, %v4240_v2, 0.0 }
 0x1e5   : > { %1550 = vadd.xlane.f32.xlu1 %v1549_v56 }
 0x24d   : > { %v1506_v26 = vpop.xlane.xlu0 %1505 }
 0x24e   : > { %3450 = vrcp.f32 %v1506_v26 }
 0x251   : > { %v1512_v12 = vpop.xlane.xlu0 %1511 }
 0x252   : > { %v1509_v43 = vpop.xlane.xlu1 %1508  ;;  %3452 = vrcp.f32 %v1512_v12 }
 0x253   : > { %3454 = vrcp.f32 %v1509_v43 }
 0x256   : > { %v1515_v14 = vpop.xlane.xlu1 %1514  ;;  %v1518_v39 = vpop.xlane.xlu0 %1517 }
 0x257   : > { %3456 = vrcp.f32 %v1515_v14 }
 0x258   : > { %3458 = vrcp.f32 %v1518_v39 }
 0x25a   : > { %v1521_v51 = vpop.xlane.xlu1 %1520  ;;  %v1524_v29 = vpop.xlane.xlu0 %1523 }
 0x25b   : > { %v3451_v41 = vpop.eup %3450  ;;  %3460 = vrcp.f32 %v1521_v51 }
 0x25c   : > { %3462 = vrcp.f32 %v1524_v29  ;;  %v1553_v27 = vmul.f32 %v3451_v41, %v4148_v34 }
 0x25e   : > { %v1527_v31 = vpop.xlane.xlu1 %1526  ;;  %v1530_v50 = vpop.xlane.xlu0 %1529  ;;  %v1587_v46 = vsel %vm1407_vm1, %v1553_v27, 0 }
 0x25f   : > { %v3453_v28 = vpop.eup %3452  ;;  %3464 = vrcp.f32 %v1527_v31  ;;  %v4247_v55 = vand.u32 4294901760, %v1587_v46 }
 0x260   : > { %v3455_v52 = vpop.eup %3454  ;;  %3466 = vrcp.f32 %v1530_v50  ;;  %v1557_v54 = vmul.f32 %v3453_v28, %v4154_v23 }
 0x261   : > { %v1555_v1 = vmul.f32 %v3455_v52, %v4156_v8  ;;  %3274 = vmatprep.mubr.f32.mxu1 %v4247_v55  ;;  %v4253_v32 = vsub.f32 %v1587_v46, %v4247_v55 }
 0x262   : > { %v1533_v34 = vpop.xlane.xlu1 %1532  ;;  %v1536_v7 = vpop.xlane.xlu0 %1535  ;;  %v1593_v58 = vsel %vm1407_vm1, %v1557_v54, 0 }
 0x263   : > { %3468 = vrcp.f32 %v1533_v34  ;;  %v1590_v62 = vsel %vm1407_vm1, %v1555_v1, 0  ;;  %v4257_v49 = vand.u32 4294901760, %v1593_v58  ;;  %v1703_v19 = vand.u32 4294901760, %v4253_v32 }
 0x264   : > { %v3457_v30 = vpop.eup %3456  ;;  %3470 = vrcp.f32 %v1536_v7  ;;  %v4260_v23 = vand.u32 4294901760, %v1590_v62 }
 0x265   : > { %v3459_v8 = vpop.eup %3458  ;;  %v1704_v61 = vsub.f32 %v4253_v32, %v1703_v19  ;;  %v1559_v45 = vmul.f32 %v3457_v30, %v4164_v63  ;;  %v4267_v21 = vsub.f32 %v1593_v58, %v4257_v49 }
 0x266   : > { %v1539_v5 = vpop.xlane.xlu1 %1538  ;;  %v4270_v18 = vsub.f32 %v1590_v62, %v4260_v23  ;;  %3275 = vmatmul.mubr.f32.vlgmr.msra.gmra.mxu1 %v4260_v23  ;;  %v1542_v40 = vpop.xlane.xlu0 %1541  ;;  %v1561_v44 = vmul.f32 %v3459_v8, %v4166_v4 }
 0x267   : > { %3472 = vrcp.f32 %v1539_v5  ;;  %3277 = vmatprep.mubr.f32.mxu1 %v4257_v49  ;;  %v1705_v13 = vand.u32 4294901760, %v1704_v61  ;;  %v1596_v37 = vsel %vm1407_vm1, %v1559_v45, 0  ;;  %v1723_v63 = vand.u32 4294901760, %v4267_v21  ;;  %3327 = vmatpush3.msra.mxu1 %v4135_v0 }
 0x268   : > { %v3461_v36 = vpop.eup %3460  ;;  %3474 = vrcp.f32 %v1542_v40  ;;  %v4278_v9 = vand.u32 4294901760, %v1596_v37  ;;  %v1599_v59 = vsel %vm1407_vm1, %v1561_v44, 0  ;;  %v1713_v38 = vand.u32 4294901760, %v4270_v18  ;;  %3328 = vmatprep.subr.mxu1 %v4217_v20 }
 0x269   : > { %v3463_v4 = vpop.eup %3462  ;;  %3246 = vmatprep.mubr.f32.mxu0 %v1705_v13  ;;  %v4283_v48 = vand.u32 4294901760, %v1599_v59  ;;  %v1563_v53 = vmul.f32 %v3461_v36, %v4174_v35  ;;  %v1724_v42 = vsub.f32 %v4267_v21, %v1723_v63  ;;  %3329 = vmatpush3.msra.mxu1 %v4217_v20 }
 0x26a   : > { %v1545_v56 = vpop.xlane.xlu1 %1544  ;;  %3278 = vmatmul.mubr.f32.gmra.mxu1 %v4278_v9  ;;  %v1548_v10 = vpop.xlane.xlu0 %1547  ;;  %v1714_v26 = vsub.f32 %v4270_v18, %v1713_v38  ;;  %v1565_v12 = vmul.f32 %v3463_v4, %v4180_v25  ;;  %v4296_v43 = vsub.f32 %v1596_v37, %v4278_v9  ;;  %3382 = vmatprep.subr.mxu1 %v4135_v0 }
 0x26b   : > { %3476 = vrcp.f32 %v1545_v56  ;;  %3280 = vmatprep.mubr.f32.mxu1 %v4283_v48  ;;  %v1602_v35 = vsel %vm1407_vm1, %v1563_v53, 0  ;;  %v1725_v14 = vand.u32 4294901760, %v1724_v42  ;;  %v4302_v39 = vsub.f32 %v1599_v59, %v4283_v48 }
 0x26c   : > { %v3465_v51 = vpop.eup %3464  ;;  %3478 = vrcp.f32 %v1548_v10  ;;  %v1715_v29 = vand.u32 4294901760, %v1714_v26  ;;  %v4304_v41 = vand.u32 4294901760, %v1602_v35  ;;  %v1605_v25 = vsel %vm1407_vm1, %v1565_v12, 0 }
 0x26d   : > { %v3467_v27 = vpop.eup %3466  ;;  %v4307_v31 = vand.u32 4294901760, %v1605_v25  ;;  %v1733_v50 = vand.u32 4294901760, %v4296_v43  ;;  %v1567_v46 = vmul.f32 %v3465_v51, %v4190_v60  ;;  %v1743_v28 = vand.u32 4294901760, %v4302_v39 }
 0x26e   : > { %v1551_v52 = vpop.xlane.xlu1 %1550  ;;  %3247 = vmatmul.mubr.f32.vlgmr.msra.gmra.mxu0 %v1715_v29  ;;  %3281 = vmatmul.mubr.f32.gmra.mxu1 %v4304_v41  ;;  %v1569_v54 = vmul.f32 %v3467_v27, %v4194_v6  ;;  %v4315_v1 = vsub.f32 %v1602_v35, %v4304_v41 }
 0x26f   : > { %3480 = vrcp.f32 %v1551_v52  ;;  %3299 = vmatpush3.msra.mxu0 %v4178_v57  ;;  %3249 = vmatprep.mubr.f32.mxu0 %v1725_v14  ;;  %v1734_v34 = vsub.f32 %v4296_v43, %v1733_v50  ;;  %v1608_v60 = vsel %vm1407_vm1, %v1567_v46, 0  ;;  %v1744_v7 = vsub.f32 %v4302_v39, %v1743_v28 }
 0x270   : > { %v3469_v58 = vpop.eup %3468  ;;  %3283 = vmatprep.mubr.f32.mxu1 %v4307_v31  ;;  %v4326_v6 = vand.u32 4294901760, %v1608_v60  ;;  %v1611_v62 = vsel %vm1407_vm1, %v1569_v54, 0  ;;  %v1753_v57 = vand.u32 4294901760, %v4315_v1  ;;  %v4331_v30 = vsub.f32 %v1605_v25, %v4307_v31  ;;  %3300 = vmatprep.subr.mxu0 %v4222_v11 }
 0x271   : > { %v3471_v8 = vpop.eup %3470  ;;  %v1735_v61 = vand.u32 4294901760, %v1734_v34  ;;  %v1745_v45 = vand.u32 4294901760, %v1744_v7  ;;  %v4334_v5 = vand.u32 4294901760, %v1611_v62  ;;  %v1571_v40 = vmul.f32 %v3469_v58, %v4200_v47  ;;  %3301 = vmatpush3.msra.mxu0 %v4222_v11 }
 0x272   : > { %3284 = vmatmul.mubr.f32.gmra.mxu1 %v4326_v6  ;;  %v1754_v44 = vsub.f32 %v4315_v1, %v1753_v57  ;;  %v1763_v13 = vand.u32 4294901760, %v4331_v30  ;;  %v1573_v37 = vmul.f32 %v3471_v8, %v4202_v33  ;;  %v4345_v36 = vsub.f32 %v1608_v60, %v4326_v6  ;;  %3354 = vmatprep.subr.mxu0 %v4187_v17 }
 0x273   : > { %3250 = vmatmul.mubr.f32.gmra.mxu0 %v1735_v61  ;;  %3286 = vmatprep.mubr.f32.mxu1 %v4334_v5  ;;  %v1614_v47 = vsel %vm1407_vm1, %v1571_v40, 0  ;;  %v4351_v11 = vsub.f32 %v1611_v62, %v4334_v5 }
 0x274   : > { %v3473_v59 = vpop.eup %3472  ;;  %3252 = vmatprep.mubr.f32.mxu0 %v1745_v45  ;;  %v1755_v4 = vand.u32 4294901760, %v1754_v44  ;;  %v4353_v53 = vand.u32 4294901760, %v1614_v47  ;;  %v1764_v33 = vsub.f32 %v4331_v30, %v1763_v13  ;;  %v1617_v42 = vsel %vm1407_vm1, %v1573_v37, 0 }
 0x275   : > { %v3475_v56 = vpop.eup %3474  ;;  %v4359_v10 = vand.u32 4294901760, %v1617_v42  ;;  %v1773_v26 = vand.u32 4294901760, %v4345_v36  ;;  %v1575_v12 = vmul.f32 %v3473_v59, %v4208_v16  ;;  %v1783_v35 = vand.u32 4294901760, %v4351_v11 }
 0x276   : > { %3287 = vmatmul.mubr.f32.gmra.mxu1 %v4353_v53  ;;  %v1765_v14 = vand.u32 4294901760, %v1764_v33  ;;  %v1577_v51 = vmul.f32 %v3475_v56, %v4213_v22  ;;  %v4367_v29 = vsub.f32 %v1614_v47, %v4353_v53 }
 0x277   : > { %3253 = vmatmul.mubr.f32.gmra.mxu0 %v1755_v4  ;;  %3289 = vmatprep.mubr.f32.mxu1 %v4359_v10  ;;  %v1774_v25 = vsub.f32 %v4345_v36, %v1773_v26  ;;  %v1620_v27 = vsel %vm1407_vm1, %v1575_v12, 0  ;;  %v1784_v16 = vsub.f32 %v4351_v11, %v1783_v35  ;;  %v4378_v46 = vsub.f32 %v1617_v42, %v4359_v10 }
 0x278   : > { %v3477_v22 = vpop.eup %3476  ;;  %3255 = vmatprep.mubr.f32.mxu0 %v1765_v14  ;;  %v4380_v52 = vand.u32 4294901760, %v1620_v27  ;;  %v1623_v54 = vsel %vm1407_vm1, %v1577_v51, 0  ;;  %v1793_v34 = vand.u32 4294901760, %v4367_v29 }
 0x279   : > { %v3479_v60 = vpop.eup %3478  ;;  %v1775_v7 = vand.u32 4294901760, %v1774_v25  ;;  %v1785_v58 = vand.u32 4294901760, %v1784_v16  ;;  %v4384_v62 = vand.u32 4294901760, %v1623_v54  ;;  %v1579_v8 = vmul.f32 %v3477_v22, %v4224_v15 }
 0x27a   : > { %3290 = vmatmul.mubr.f32.gmra.mxu1 %v4380_v52  ;;  %v1794_v61 = vsub.f32 %v4367_v29, %v1793_v34  ;;  %v1803_v45 = vand.u32 4294901760, %v4378_v46  ;;  %v1581_v40 = vmul.f32 %v3479_v60, %v4227_v3  ;;  %v4394_v44 = vsub.f32 %v1620_v27, %v4380_v52 }
 0x27b   : > { %3256 = vmatmul.mubr.f32.gmra.mxu0 %v1775_v7  ;;  %3292 = vmatprep.mubr.f32.mxu1 %v4384_v62  ;;  %v1626_v37 = vsel %vm1407_vm1, %v1579_v8, 0  ;;  %v4399_v15 = vsub.f32 %v1623_v54, %v4384_v62 }
 0x27c   : > { %v3481_v47 = vpop.eup %3480  ;;  %3258 = vmatprep.mubr.f32.mxu0 %v1785_v58  ;;  %v1795_v59 = vand.u32 4294901760, %v1794_v61  ;;  %v4401_v4 = vand.u32 4294901760, %v1626_v37  ;;  %v1804_v3 = vsub.f32 %v4378_v46, %v1803_v45  ;;  %v1629_v33 = vsel %vm1407_vm1, %v1581_v40, 0 }
 0x27d   : > { %v4407_v42 = vand.u32 4294901760, %v1629_v33  ;;  %v1813_v56 = vand.u32 4294901760, %v4394_v44  ;;  %v1583_v12 = vmul.f32 %v3481_v47, %v4240_v2  ;;  %v1823_v14 = vand.u32 4294901760, %v4399_v15 }
 0x27e   : > { %3293 = vmatmul.mubr.f32.gmra.mxu1 %v4401_v4  ;;  %v1805_v51 = vand.u32 4294901760, %v1804_v3  ;;  %v4414_v25 = vsub.f32 %v1626_v37, %v4401_v4 }
 0x27f   : > { %3259 = vmatmul.mubr.f32.gmra.mxu0 %v1795_v59  ;;  %3295 = vmatprep.mubr.f32.mxu1 %v4407_v42  ;;  %v1814_v27 = vsub.f32 %v4394_v44, %v1813_v56  ;;  %v1632_v16 = vsel %vm1407_vm1, %v1583_v12, 0  ;;  %v1824_v22 = vsub.f32 %v4399_v15, %v1823_v14  ;;  %v1842_v54 = vsub.f32 %v1629_v33, %v4407_v42 }
 0x280   : > { %3261 = vmatprep.mubr.f32.mxu0 %v1805_v51  ;;  %v4421_v2 = vand.u32 4294901760, %v1632_v16  ;;  %v1833_v60 = vand.u32 4294901760, %v4414_v25 }
 0x281   : > { %v1815_v7 = vand.u32 4294901760, %v1814_v27  ;;  %v1825_v58 = vand.u32 4294901760, %v1824_v22  ;;  %v1843_v8 = vand.u32 4294901760, %v1842_v54 }
 0x282   : > { %3296 = vmatmul.mubr.f32.gmra.mxu1 %v4421_v2  ;;  %v1834_v61 = vsub.f32 %v4414_v25, %v1833_v60  ;;  %v1852_v40 = vsub.f32 %v1632_v16, %v4421_v2 }
 0x283   : > { %3262 = vmatmul.mubr.f32.gmra.mxu0 %v1815_v7  ;;  %3330 = vmatprep.mubr.f32.mxu1 %v1703_v19  ;;  %v1844_v37 = vsub.f32 %v1842_v54, %v1843_v8 }
 0x284   : > { %3264 = vmatprep.mubr.f32.mxu0 %v1825_v58  ;;  %v1835_v47 = vand.u32 4294901760, %v1834_v61  ;;  %v1853_v59 = vand.u32 4294901760, %v1852_v40 }
 0x285   : > { %v1845_v3 = vand.u32 4294901760, %v1844_v37 }
 0x286   : > { %3331 = vmatmul.mubr.f32.vlgmr.msra.gmra.mxu1 %v1713_v38  ;;  %v1854_v33 = vsub.f32 %v1852_v40, %v1853_v59 }
 0x287   : > { %3265 = vmatmul.mubr.f32.gmra.mxu0 %v1835_v47  ;;  %3333 = vmatprep.mubr.f32.mxu1 %v1723_v63 }
 0x288   : > { %3267 = vmatprep.mubr.f32.mxu0 %v1845_v3  ;;  %v1855_v12 = vand.u32 4294901760, %v1854_v33  ;;  %3383 = vmatpush3.msra.mxu1 %v4135_v0 }
 0x289   : > { %3384 = vmatprep.subr.mxu1 %v4217_v20 }
 0x28a   : > { %3334 = vmatmul.mubr.f32.gmra.mxu1 %v1733_v50 }
 0x28b   : > { %3268 = vmatmul.mubr.f32.gmra.mxu0 %v1855_v12  ;;  %3336 = vmatprep.mubr.f32.mxu1 %v1743_v28 }
 0x28c   : > { %3302 = vmatprep.mubr.f32.mxu0 %v4253_v32  ;;  %3385 = vmatpush3.msra.mxu1 %v4217_v20 }
 0x28e   : > { %3337 = vmatmul.mubr.f32.gmra.mxu1 %v1753_v57 }
 0x28f   : > { %3303 = vmatmul.mubr.f32.vlgmr.msra.gmra.mxu0 %v4270_v18  ;;  %3339 = vmatprep.mubr.f32.mxu1 %v1763_v13 }
 0x290   : > { %3355 = vmatpush3.msra.mxu0 %v4187_v17  ;;  %3305 = vmatprep.mubr.f32.mxu0 %v4267_v21 }
 0x291   : > { %3356 = vmatprep.subr.mxu0 %v4233_v24 }
 0x292   : > { %3340 = vmatmul.mubr.f32.gmra.mxu1 %v1773_v26  ;;  %3357 = vmatpush3.msra.mxu0 %v4233_v24 }
 0x293   : > { %3306 = vmatmul.mubr.f32.gmra.mxu0 %v4296_v43  ;;  %3342 = vmatprep.mubr.f32.mxu1 %v1783_v35 }
 0x294   : > { %3308 = vmatprep.mubr.f32.mxu0 %v4302_v39 }
 0x296   : > { %3343 = vmatmul.mubr.f32.gmra.mxu1 %v1793_v34 }
 0x297   : > { %3309 = vmatmul.mubr.f32.gmra.mxu0 %v4315_v1  ;;  %3345 = vmatprep.mubr.f32.mxu1 %v1803_v45 }
 0x298   : > { %3311 = vmatprep.mubr.f32.mxu0 %v4331_v30 }
 0x29a   : > { %3346 = vmatmul.mubr.f32.gmra.mxu1 %v1813_v56 }
 0x29b   : > { %3312 = vmatmul.mubr.f32.gmra.mxu0 %v4345_v36  ;;  %3348 = vmatprep.mubr.f32.mxu1 %v1823_v14 }
 0x29c   : > { %3314 = vmatprep.mubr.f32.mxu0 %v4351_v11 }
 0x29e   : > { %3349 = vmatmul.mubr.f32.gmra.mxu1 %v1833_v60 }
 0x29f   : > { %3315 = vmatmul.mubr.f32.gmra.mxu0 %v4367_v29  ;;  %3351 = vmatprep.mubr.f32.mxu1 %v1843_v8 }
 0x2a0   : > { %3317 = vmatprep.mubr.f32.mxu0 %v4378_v46 }
 0x2a2   : > { %3352 = vmatmul.mubr.f32.gmra.mxu1 %v1853_v59 }
 0x2a3   : > { %3318 = vmatmul.mubr.f32.gmra.mxu0 %v4394_v44  ;;  %3386 = vmatprep.mubr.f32.mxu1 %v4247_v55 }
 0x2a4   : > { %3320 = vmatprep.mubr.f32.mxu0 %v4399_v15 }
 0x2a6   : > { %3387 = vmatmul.mubr.f32.vlgmr.msra.gmra.mxu1 %v4260_v23 }
 0x2a7   : > { %3321 = vmatmul.mubr.f32.gmra.mxu0 %v4414_v25  ;;  %3389 = vmatprep.mubr.f32.mxu1 %v4257_v49 }
 0x2a8   : > { %3323 = vmatprep.mubr.f32.mxu0 %v1842_v54 }
 0x2aa   : > { %3390 = vmatmul.mubr.f32.gmra.mxu1 %v4278_v9 }
 0x2ab   : > { %3324 = vmatmul.mubr.f32.gmra.mxu0 %v1852_v40  ;;  %3392 = vmatprep.mubr.f32.mxu1 %v4283_v48 }
 0x2ac   : > { %3358 = vmatprep.mubr.f32.mxu0 %v4247_v55 }
 0x2ae   : > { %3393 = vmatmul.mubr.f32.gmra.mxu1 %v4304_v41 }
 0x2af   : > { %3359 = vmatmul.mubr.f32.vlgmr.msra.gmra.mxu0 %v4260_v23  ;;  %3395 = vmatprep.mubr.f32.mxu1 %v4307_v31 }
 0x2b0   : > { %3361 = vmatprep.mubr.f32.mxu0 %v4257_v49 }
 0x2b2   : > { %3396 = vmatmul.mubr.f32.gmra.mxu1 %v4326_v6 }
 0x2b3   : > { %3362 = vmatmul.mubr.f32.gmra.mxu0 %v4278_v9  ;;  %3398 = vmatprep.mubr.f32.mxu1 %v4334_v5 }
 0x2b4   : > { %3364 = vmatprep.mubr.f32.mxu0 %v4283_v48 }
 0x2b6   : > { %3399 = vmatmul.mubr.f32.gmra.mxu1 %v4353_v53 }
 0x2b7   : > { %3365 = vmatmul.mubr.f32.gmra.mxu0 %v4304_v41  ;;  %3401 = vmatprep.mubr.f32.mxu1 %v4359_v10 }
 0x2b8   : > { %3367 = vmatprep.mubr.f32.mxu0 %v4307_v31 }
 0x2ba   : > { %3402 = vmatmul.mubr.f32.gmra.mxu1 %v4380_v52 }
 0x2bb   : > { %3368 = vmatmul.mubr.f32.gmra.mxu0 %v4326_v6  ;;  %3404 = vmatprep.mubr.f32.mxu1 %v4384_v62 }
 0x2bc   : > { %3370 = vmatprep.mubr.f32.mxu0 %v4334_v5 }
 0x2be   : > { %3405 = vmatmul.mubr.f32.gmra.mxu1 %v4401_v4 }
 0x2bf   : > { %3371 = vmatmul.mubr.f32.gmra.mxu0 %v4353_v53  ;;  %3407 = vmatprep.mubr.f32.mxu1 %v4407_v42 }
 0x2c0   : > { %3373 = vmatprep.mubr.f32.mxu0 %v4359_v10 }
 0x2c2   : > { %3408 = vmatmul.mubr.f32.gmra.mxu1 %v4421_v2 }
 0x2c3   : > { %3374 = vmatmul.mubr.f32.gmra.mxu0 %v4380_v52 }
 0x2c4   : > { %3376 = vmatprep.mubr.f32.mxu0 %v4384_v62 }
 0x2c7   : > { %3377 = vmatmul.mubr.f32.gmra.mxu0 %v4401_v4 }
 0x2c8   : > { %3379 = vmatprep.mubr.f32.mxu0 %v4407_v42 }
 0x2cb   : > { %3380 = vmatmul.mubr.f32.gmra.mxu0 %v4421_v2 }
 0x326   : > { %v3276_v0 = vpop.f32.mrf.mxu1 }
 0x328   : > { %v4501_v17 = vpop.f32.mrf.mxu1 }
 0x32a   : > { %v4503_v20 = vpop.f32.mrf.mxu1 }
 0x32c   : > { %v4505_v24 = vpop.f32.mrf.mxu1 }
 0x32e   : > { %v3248_v55 = vpop.f32.mrf.mxu0  ;;  %v4507_v32 = vpop.f32.mrf.mxu1 }
 0x32f   : > { %v1945_v33 = vadd.f32 %v3276_v0, %v3248_v55 }
 0x330   : > { %v1707_v49 = vpop.f32.mrf.mxu0  ;;  %v4509_v19 = vpop.f32.mrf.mxu1 }
 0x332   : > { %v4511_v23 = vpop.f32.mrf.mxu1 }
 0x333   : > { %v3251_v21 = vpop.f32.mrf.mxu0 }
 0x334   : > { %v4513_v18 = vpop.f32.mrf.mxu1 }
 0x335   : > { %v1727_v63 = vpop.f32.mrf.mxu0 }
 0x336   : > { %v4515_v9 = vpop.f32.mrf.mxu1 }
 0x337   : > { %v4517_v38 = vpop.f32.mrf.mxu0 }
 0x338   : > { %v4519_v48 = vpop.f32.mrf.mxu1 }
 0x339   : > { %v4521_v43 = vpop.f32.mrf.mxu0 }
 0x33a   : > { %v4523_v39 = vpop.f32.mrf.mxu1 }
 0x33b   : > { %v4525_v41 = vpop.f32.mrf.mxu0 }
 0x33c   : > { %v4527_v31 = vpop.f32.mrf.mxu1 }
 0x33d   : > { %v4529_v50 = vpop.f32.mrf.mxu0 }
 0x33e   : > { %v4531_v28 = vpop.f32.mrf.mxu1 }
 0x33f   : > { %v4533_v1 = vpop.f32.mrf.mxu0 }
 0x340   : > { %v4535_v6 = vpop.f32.mrf.mxu1 }
 0x341   : > { %4712 = vst [vmem:[#allocation4_spill] sm:$0xff] %v4535_v6  ;;  %v4537_v57 = vpop.f32.mrf.mxu0 }
 0x342   : > { %v4539_v30 = vpop.f32.mrf.mxu1 }
 0x343   : > { %4713 = vst [vmem:[#allocation5_spill] sm:$0xff] %v4539_v30  ;;  %v4541_v5 = vpop.f32.mrf.mxu0 }
 0x344   : > { %v4543_v13 = vpop.f32.mrf.mxu1 }
 0x345   : > { %4714 = vst [vmem:[#allocation8_spill] sm:$0xff] %v4543_v13  ;;  %v4545_v36 = vpop.f32.mrf.mxu0  ;;  %v1939_v13 = vadd.f32 %v4501_v17, %v1707_v49  ;;  %v1969_v17 = vadd.f32 %v4507_v32, %v4517_v38 }
 0x346   : > { %v3332_v11 = vpop.f32.mrf.mxu1 }
 0x347   : > { %v4547_v53 = vpop.f32.mrf.mxu0 }
 0x348   : > { %v2284_v10 = vpop.f32.mrf.mxu1 }
 0x349   : > { %v4549_v26 = vpop.f32.mrf.mxu0 }
 0x34a   : > { %v3335_v35 = vpop.f32.mrf.mxu1 }
 0x34b   : > { %v4551_v29 = vpop.f32.mrf.mxu0 }
 0x34c   : > { %4715 = vst [vmem:[#allocation6_spill] sm:$0xff] %v4551_v29  ;;  %v4553_v46 = vpop.f32.mrf.mxu1 }
 0x34d   : > { %v4555_v52 = vpop.f32.mrf.mxu0 }
 0x34e   : > { %4716 = vst [vmem:[#allocation2_spill] sm:$0xff] %v4555_v52  ;;  %v4557_v34 = vpop.f32.mrf.mxu1 }
 0x34f   : > { %v3304_v62 = vpop.f32.mrf.mxu0 }
 0x350   : > { %v4559_v45 = vpop.f32.mrf.mxu1 }
 0x351   : > { %v2104_v44 = vpop.f32.mrf.mxu0 }
 0x352   : > { %v4561_v15 = vpop.f32.mrf.mxu1  ;;  %v2105_v30 = vadd.f32 %v2104_v44, %v1939_v13 }
 0x353   : > { %v3307_v4 = vpop.f32.mrf.mxu0 }
 0x354   : > { %v4563_v42 = vpop.f32.mrf.mxu1 }
 0x355   : > { %v2118_v56 = vpop.f32.mrf.mxu0 }
 0x356   : > { %v4565_v14 = vpop.f32.mrf.mxu1 }
 0x357   : > { %v3310_v51 = vpop.f32.mrf.mxu0 }
 0x358   : > { %v4567_v25 = vpop.f32.mrf.mxu1 }
 0x359   : > { %v2132_v27 = vpop.f32.mrf.mxu0 }
 0x35a   : > { %v4569_v16 = vpop.f32.mrf.mxu1 }
 0x35b   : > { %4717 = vst [vmem:[#allocation3_spill] sm:$0xff] %v4569_v16  ;;  %v3313_v22 = vpop.f32.mrf.mxu0  ;;  %v1951_v16 = vadd.f32 %v4505_v24, %v1727_v63 }
 0x35c   : > { %v4571_v54 = vpop.f32.mrf.mxu1 }
 0x35d   : > { %4718 = vst [vmem:[#allocation7_spill] sm:$0xff] %v4571_v54  ;;  %v2146_v2 = vpop.f32.mrf.mxu0  ;;  %v2119_v49 = vadd.f32 %v2118_v56, %v1951_v16  ;;  %v1993_v16 = vadd.f32 %v4515_v9, %v4533_v1 }
 0x35e   : > { %v4573_v60 = vpop.f32.mrf.mxu1 }
 0x35f   : > { %4719 = vst [vmem:[#allocation9_spill] sm:$0xff] %v4573_v60  ;;  %v4575_v7 = vpop.f32.mrf.mxu0 }
 0x360   : > { %v4577_v58 = vpop.f32.mrf.mxu1 }
 0x361   : > { %4720 = vst [vmem:[#allocation10_spill] sm:$0xff] %v4577_v58  ;;  %v4579_v8 = vpop.f32.mrf.mxu0  ;;  %v2112_v58 = vadd.f32 %v3304_v62, %v1945_v33  ;;  %v2285_v33 = vadd.f32 %v2284_v10, %v2105_v30  ;;  %v2301_v10 = vadd.f32 %v4553_v46, %v2119_v49 }
 0x362   : > { %v4581_v61 = vpop.f32.mrf.mxu1 }
 0x363   : > { %4721 = vst [vmem:[#allocation11_spill] sm:$0xff] %v4581_v61  ;;  %v4583_v40 = vpop.f32.mrf.mxu0  ;;  %v1957_v61 = vadd.f32 %v4503_v20, %v3251_v21  ;;  %v2293_v0 = vadd.f32 %v3332_v11, %v2112_v58  ;;  %v1963_v20 = vadd.f32 %v4509_v19, %v4521_v43  ;;  %v2140_v21 = vadd.f32 %v3310_v51, %v1969_v17 }
 0x364   : > { %v4585_v37 = vpop.f32.mrf.mxu1  ;;  %v2017_v17 = vadd.f32 %v4531_v28, %v4547_v53 }
 0x365   : > { %4722 = vst [vmem:[#allocation12_spill] sm:$0xff] %v4585_v37  ;;  %v4587_v47 = vpop.f32.mrf.mxu0  ;;  %v2133_v11 = vadd.f32 %v2132_v27, %v1963_v20 }
 0x366   : > { %v3388_v59 = vpop.f32.mrf.mxu1 }
 0x367   : > { %v4589_v3 = vpop.f32.mrf.mxu0 }
 0x368   : > { %4723 = vst [vmem:[#allocation13_spill] sm:$0xff] %v4589_v3  ;;  %v2644_v12 = vpop.f32.mrf.mxu1  ;;  %v2126_v3 = vadd.f32 %v3307_v4, %v1957_v61  ;;  %v1975_v4 = vadd.f32 %v4513_v18, %v4529_v50  ;;  %v2317_v50 = vadd.f32 %v4559_v45, %v2133_v11  ;;  %v4730_v11 = vld [vmem:[#allocation7_spill] sm:$0xff] }
 0x369   : > { %v4591_v60 = vpop.f32.mrf.mxu0 }
 0x36a   : > { %v3391_v52 = vpop.f32.mrf.mxu1  ;;  %v2309_v32 = vadd.f32 %v3335_v35, %v2126_v3  ;;  %v2147_v61 = vadd.f32 %v2146_v2, %v1975_v4 }
 0x36b   : > { %v4594_v54 = vpop.f32.mrf.mxu0 }
 0x36c   : > { %4724 = vst [vmem:[#allocation14_spill] sm:$0xff] %v4594_v54  ;;  %v2656_v37 = vpop.f32.mrf.mxu1 }
 0x36d   : > { %v4597_v29 = vpop.f32.mrf.mxu0 }
 0x36e   : > { %v3394_v55 = vpop.f32.mrf.mxu1 }
 0x36f   : > { %v3360_v6 = vpop.f32.mrf.mxu0 }
 0x370   : > { %v2488_v62 = vadd.f32 %v3360_v6, %v2293_v0  ;;  %v2668_v54 = vpop.f32.mrf.mxu1  ;;  %v1981_v6 = vadd.f32 %v4511_v23, %v4525_v41  ;;  %v2325_v41 = vadd.f32 %v4557_v34, %v2140_v21  ;;  %v2168_v34 = vadd.f32 %v4575_v7, %v1993_v16  ;;  %v4727_v21 = vld [vmem:[#allocation3_spill] sm:$0xff] }
 0x371   : > { %v2481_v24 = vpop.f32.mrf.mxu0  ;;  %v2333_v7 = vadd.f32 %v4563_v42, %v2147_v61  ;;  %v1999_v0 = vadd.f32 %v4527_v31, %v4545_v36 }
 0x372   : > { %v2651_v63 = vadd.f32 %v3388_v59, %v2488_v62  ;;  %v2482_v13 = vadd.f32 %v2481_v24, %v2285_v33  ;;  %v3397_v38 = vpop.f32.mrf.mxu1  ;;  %v2154_v51 = vadd.f32 %v3313_v22, %v1981_v6  ;;  %v4725_v62 = vld [vmem:[#allocation4_spill] sm:$0xff]  ;;  %v4726_v24 = vld [vmem:[#allocation13_spill] sm:$0xff] }
 0x373   : > { %v3363_v30 = vpop.f32.mrf.mxu0  ;;  %v2175_v42 = vadd.f32 %v4587_v47, %v1999_v0  ;;  %v2011_v33 = vadd.f32 %v4725_v62, %v4549_v26 }
 0x374   : > { %2739 = vst.msk [vmem:[%s4609_s12 + $0x8] sm:$0xff] %vm228_vm0, %v2651_v63  ;;  %v2645_v19 = vadd.f32 %v2644_v12, %v2482_v13  ;;  %v2500_v43 = vadd.f32 %v3363_v30, %v2309_v32  ;;  %v2680_v44 = vpop.f32.mrf.mxu1  ;;  %v2341_v2 = vadd.f32 %v4561_v15, %v2154_v51  ;;  %v4728_v63 = vld [vmem:[#allocation6_spill] sm:$0xff]  ;;  %v4729_v13 = vld [vmem:[#allocation5_spill] sm:$0xff] }
 0x375   : > { %v2493_v56 = vpop.f32.mrf.mxu0  ;;  %v2029_v32 = vadd.f32 %v4729_v13, %v4728_v63 }
 0x376   : > { %2738 = vst.msk [vmem:[%s4609_s12] sm:$0xff] %vm228_vm0, %v2645_v19  ;;  %v2663_v35 = vadd.f32 %v3391_v52, %v2500_v43  ;;  %v2494_v23 = vadd.f32 %v2493_v56, %v2301_v10  ;;  %v3400_v27 = vpop.f32.mrf.mxu1  ;;  %v1987_v52 = vadd.f32 %v4519_v48, %v4537_v57  ;;  %v2365_v19 = vadd.f32 %v4730_v11, %v2175_v42  ;;  %v4731_v43 = vld [vmem:[#allocation2_spill] sm:$0xff]  ;;  %v4732_v10 = vld [vmem:[#allocation8_spill] sm:$0xff] }
 0x377   : > { %v3366_v58 = vpop.f32.mrf.mxu0  ;;  %v4733_v56 = vld [vmem:[#allocation14_spill] sm:$0xff] }
 0x378   : > { %2741 = vst.msk [vmem:[%s4609_s12 + $0x18] sm:$0xff] %vm228_vm0, %v2663_v35  ;;  %v2657_v46 = vadd.f32 %v2656_v37, %v2494_v23  ;;  %v2512_v18 = vadd.f32 %v3366_v58, %v2325_v41  ;;  %v2692_v22 = vpop.f32.mrf.mxu1  ;;  %v2005_v37 = vadd.f32 %v4523_v39, %v4541_v5  ;;  %v2161_v45 = vadd.f32 %v4579_v8, %v1987_v52  ;;  %v4734_v41 = vld [vmem:[#allocation9_spill] sm:$0xff] }
 0x379   : > { %v2505_v59 = vpop.f32.mrf.mxu0  ;;  %v2357_v8 = vadd.f32 %v4565_v14, %v2168_v34  ;;  %v2196_v14 = vadd.f32 %v4726_v24, %v2017_v17  ;;  %v2210_v51 = vadd.f32 %v4733_v56, %v2029_v32  ;;  %v4736_v34 = vld [vmem:[#allocation11_spill] sm:$0xff] }
 0x37a   : > { %2740 = vst.msk [vmem:[%s4609_s12 + $0x10] sm:$0xff] %vm228_vm0, %v2657_v46  ;;  %v2675_v9 = vadd.f32 %v3394_v55, %v2512_v18  ;;  %v2506_v1 = vadd.f32 %v2505_v59, %v2317_v50  ;;  %v3403_v12 = vpop.f32.mrf.mxu1  ;;  %v2182_v15 = vadd.f32 %v4583_v40, %v2005_v37  ;;  %v2349_v40 = vadd.f32 %v4567_v25, %v2161_v45  ;;  %v4735_v18 = vld [vmem:[#allocation10_spill] sm:$0xff] }
 0x37b   : > { %v3369_v3 = vpop.f32.mrf.mxu0  ;;  %v2189_v25 = vadd.f32 %v4591_v60, %v2011_v33  ;;  %v2389_v60 = vadd.f32 %v4734_v41, %v2196_v14 }
 0x37c   : > { %2743 = vst.msk [vmem:[%s4609_s12 + $0x28] sm:$0xff] %vm228_vm0, %v2675_v9  ;;  %v2669_v48 = vadd.f32 %v2668_v54, %v2506_v1  ;;  %v2524_v57 = vadd.f32 %v3369_v3, %v2341_v2  ;;  %v2704_v54 = vpop.f32.mrf.mxu1  ;;  %v2373_v47 = vadd.f32 %v4727_v21, %v2182_v15  ;;  %v2405_v9 = vadd.f32 %v4736_v34, %v2210_v51  ;;  %v4737_v3 = vld [vmem:[#allocation12_spill] sm:$0xff] }
 0x37d   : > { %v2517_v55 = vpop.f32.mrf.mxu0  ;;  %v2381_v50 = vadd.f32 %v4735_v18, %v2189_v25 }
 0x37e   : > { %2742 = vst.msk [vmem:[%s4609_s12 + $0x20] sm:$0xff] %vm228_vm0, %v2669_v48  ;;  %v2687_v39 = vadd.f32 %v3397_v38, %v2524_v57  ;;  %v2518_v5 = vadd.f32 %v2517_v55, %v2333_v7  ;;  %v3406_v38 = vpop.f32.mrf.mxu1 }
 0x37f   : > { %v3372_v49 = vpop.f32.mrf.mxu0 }
 0x380   : > { %2745 = vst.msk [vmem:[%s4609_s12 + $0x38] sm:$0xff] %vm228_vm0, %v2687_v39  ;;  %v2681_v31 = vadd.f32 %v2680_v44, %v2518_v5  ;;  %v2536_v36 = vadd.f32 %v3372_v49, %v2357_v8  ;;  %v2023_v44 = vadd.f32 %v4732_v10, %v4731_v43 }
 0x381   : > { %v2529_v20 = vpop.f32.mrf.mxu0 }
 0x382   : > { %2744 = vst.msk [vmem:[%s4609_s12 + $0x30] sm:$0xff] %vm228_vm0, %v2681_v31  ;;  %v2699_v28 = vadd.f32 %v3400_v27, %v2536_v36  ;;  %v2530_v53 = vadd.f32 %v2529_v20, %v2349_v40  ;;  %v2716_v27 = vpop.f32.mrf.mxu1  ;;  %v2203_v58 = vadd.f32 %v4597_v29, %v2023_v44 }
 0x383   : > { %v3375_v6 = vpop.f32.mrf.mxu0 }
 0x384   : > { %2747 = vst.msk [vmem:[%s4609_s12 + $0x48] sm:$0xff] %vm228_vm0, %v2699_v28  ;;  %v2693_v26 = vadd.f32 %v2692_v22, %v2530_v53  ;;  %v2548_v30 = vadd.f32 %v3375_v6, %v2373_v47  ;;  %v3409_v1 = vpop.f32.mrf.mxu1 }
 0x385   : > { %v2541_v4 = vpop.f32.mrf.mxu0 }
 0x386   : > { %2746 = vst.msk [vmem:[%s4609_s12 + $0x40] sm:$0xff] %vm228_vm0, %v2693_v26  ;;  %v2711_v35 = vadd.f32 %v3403_v12, %v2548_v30  ;;  %v2542_v23 = vadd.f32 %v2541_v4, %v2365_v19  ;;  %v2397_v12 = vadd.f32 %v4737_v3, %v2203_v58  ;;  %v2728_v7 = vpop.f32.mrf.mxu1 }
 0x387   : > { %v3378_v16 = vpop.f32.mrf.mxu0 }
 0x388   : > { %2749 = vst.msk [vmem:[%s4609_s12 + $0x58] sm:$0xff] %vm228_vm0, %v2711_v35  ;;  %v2705_v61 = vadd.f32 %v2704_v54, %v2542_v23  ;;  %v2560_v46 = vadd.f32 %v3378_v16, %v2389_v60 }
 0x389   : > { %v2553_v22 = vpop.f32.mrf.mxu0 }
 0x38a   : > { %2748 = vst.msk [vmem:[%s4609_s12 + $0x50] sm:$0xff] %vm228_vm0, %v2705_v61  ;;  %v2723_v52 = vadd.f32 %v3406_v38, %v2560_v46  ;;  %v2554_v59 = vadd.f32 %v2553_v22, %v2381_v50 }
 0x38b   : > { %v3381_v2 = vpop.f32.mrf.mxu0 }
 0x38c   : > { %2751 = vst.msk [vmem:[%s4609_s12 + $0x68] sm:$0xff] %vm228_vm0, %v2723_v52  ;;  %v2717_v29 = vadd.f32 %v2716_v27, %v2554_v59  ;;  %v2572_v37 = vadd.f32 %v3381_v2, %v2405_v9 }
 0x38d   : > { %v2565_v45 = vpop.f32.mrf.mxu0 }
 0x38e   : > { %2750 = vst.msk [vmem:[%s4609_s12 + $0x60] sm:$0xff] %vm228_vm0, %v2717_v29  ;;  %v2735_v48 = vadd.f32 %v3409_v1, %v2572_v37  ;;  %v2566_v57 = vadd.f32 %v2565_v45, %v2397_v12 }
 0x390   : > { %2753 = vst.msk [vmem:[%s4609_s12 + $0x78] sm:$0xff] %vm228_vm0, %v2735_v48  ;;  %v2729_v0 = vadd.f32 %v2728_v7, %v2566_v57 }
 0x392   : > { %2752 = vst.msk [vmem:[%s4609_s12 + $0x70] sm:$0xff] %vm228_vm0, %v2729_v0 }
 0x393 PF: > { %s14_s15 = sadd.s32 1, %s3488_s15  }
 0x394   : > { %p11_p4 = scmp.ge.s32.totalorder %s14_s15, 6  }
 0x396   :  { %13 = sbr.rel (!%p11_p4) target bundleno = 1 (0x1), region = 66 }

</bundles_post_ra>
